<compile_context>
chip_gen: v7x
topology: tpu7x:2x2x1
jax: 0.10.0
libtpu: 0.0.40
codegen_flags: <defaults>
</compile_context>

<pallas_src>
import functools
import math

import jax
import jax.numpy as jnp
from jax.experimental import pallas as pl
from jax.experimental.pallas import tpu as pltpu

# ------------------------- config (small synthetic) -------------------------
SAMPLES = 170          # waveform samples
CONV_C = 32            # conv feature channels (HuBERT: 512)
K1, STRIDE1 = 10, 5    # first conv (HuBERT layer 0: k=10, s=5)
K2, STRIDE2 = 3, 2     # second conv (HuBERT layers 1-4: k=3, s=2)
HIDDEN = 32            # transformer hidden (HuBERT: 768)
NUM_HEADS = 4          # attention heads (HuBERT: 12)
FFN = 64               # feed-forward dim (HuBERT: 3072)
NUM_LAYERS = 2         # transformer layers (HuBERT: 12)
EPS = 1e-5

# -------- packed bias/gain slab layout (one (24,128) f32 input) --------------
SLAB_LANES = 128
ROW_GN_G, ROW_GN_B = 0, 1          # GroupNorm gain/bias        (width C)
ROW_FP_LN_G, ROW_FP_LN_B = 2, 3    # feature-proj LN gain/bias  (width C)
ROW_PROJ_B = 4                     # projection bias            (width H)
ROW_ENC_LN_G, ROW_ENC_LN_B = 5, 6  # encoder LN gain/bias       (width H)
LAYER_BASE = 7                     # per-layer rows start here
OFF_BQKV, OFF_BO = 0, 1            # (width 3H), (width H)
OFF_LN1_G, OFF_LN1_B = 2, 3        # (width H)
OFF_FF1_B, OFF_FF2_B = 4, 5        # (width F), (width H)
OFF_LN2_G, OFF_LN2_B = 6, 7        # (width H)
PER_LAYER_ROWS = 8
SLAB_ROWS = ((LAYER_BASE + NUM_LAYERS * PER_LAYER_ROWS + 7) // 8) * 8   # 24


# ------------------------------ fused Pallas kernel -------------------------

def _hubert_fused_kernel(
    p1_ref,                                  # (1, T1, K1) f32 conv-0 im2col patches
    slab_ref,                                # (SLAB_ROWS, 128) f32 packed gains/biases
    conv1_w_ref,                             # (K1, C)      bf16
    conv2_w_ref,                             # (K2*C, C)    bf16 (tap-major rows)
    proj_w_ref,                              # (C, H)       bf16
    wqkv_ref,                                # (L, H, 3H)   bf16 (1/sqrt(hd) folded into Q cols)
    wo_ref,                                  # (L, H, H)    bf16
    ff1_w_ref,                               # (L, H, F)    bf16
    ff2_w_ref,                               # (L, F, H)    bf16
    out_ref,                                 # (1, 1, H)    f32
    h_scr,                                   # VMEM (T1, C) f32 scratch for strided conv-1 taps
    *, num_heads, num_layers, eps,
):
    f32, bf16 = jnp.float32, jnp.bfloat16

    def vec(row, width):
        # static row/lane slice of the packed bias slab -> (1, width) f32
        return slab_ref[row:row + 1, :width]

    def layer_norm(x, g, b):
        mu = jnp.mean(x, axis=-1, keepdims=True)
        var = jnp.mean(jnp.square(x - mu), axis=-1, keepdims=True)
        return (x - mu) * jax.lax.rsqrt(var + eps) * g + b

    # ---- conv layer 0: Conv1d(1->C, k=10, s=5, bias=False) -> GroupNorm -> GELU
    p1 = p1_ref[0].astype(bf16)                                       # (T1, K1)
    h = jnp.dot(p1, conv1_w_ref[...], preferred_element_type=f32)     # (T1, C) f32
    # GroupNorm(C, C) == per-channel normalization over the time axis.
    mu = jnp.mean(h, axis=0, keepdims=True)
    var = jnp.mean(jnp.square(h - mu), axis=0, keepdims=True)
    h = ((h - mu) * jax.lax.rsqrt(var + eps)
         * vec(ROW_GN_G, CONV_C) + vec(ROW_GN_B, CONV_C))
    h = jax.nn.gelu(h, approximate=True)

    # ---- conv layer 1: Conv1d(C->C, k=3, s=2, bias=False) -> GELU
    # Taps via sublane-strided reads from a VMEM scratch (no selection matmuls),
    # lane-concatenated into one deeper (T2, K2*C)@(K2*C, C) MXU matmul.
    h_scr[...] = h
    t1, c = h_scr.shape
    t2 = (t1 - K2) // STRIDE2 + 1
    taps = jnp.concatenate(
        [h_scr[pl.ds(j, t2, stride=STRIDE2), :] for j in range(K2)], axis=-1)
    h = jnp.dot(taps.astype(bf16), conv2_w_ref[...],
                preferred_element_type=f32)                           # (T2, C)
    h = jax.nn.gelu(h, approximate=True)

    # ---- feature projection: LayerNorm(C) -> Linear(C, H) -> LayerNorm(H)
    x = layer_norm(h, vec(ROW_FP_LN_G, CONV_C), vec(ROW_FP_LN_B, CONV_C))
    x = (jnp.dot(x.astype(bf16), proj_w_ref[...], preferred_element_type=f32)
         + vec(ROW_PROJ_B, HIDDEN))
    # TODO(synk): HuBERT's grouped positional conv embedding (k=128, groups=16) omitted.
    x = layer_norm(x, vec(ROW_ENC_LN_G, HIDDEN), vec(ROW_ENC_LN_B, HIDDEN))  # (T2, H)

    hidden = x.shape[-1]
    hd = hidden // num_heads

    # ---- post-LN transformer encoder layers
    for l in range(num_layers):
        base = LAYER_BASE + l * PER_LAYER_ROWS
        # single fused QKV matmul (scale already folded into Q weight columns)
        qkv = (jnp.dot(x.astype(bf16), wqkv_ref[l], preferred_element_type=f32)
               + vec(base + OFF_BQKV, 3 * hidden))
        qb = qkv[:, :hidden].astype(bf16)
        kb = qkv[:, hidden:2 * hidden].astype(bf16)
        vb = qkv[:, 2 * hidden:].astype(bf16)
        ctx_parts = []
        for hh in range(num_heads):
            lo, hi = hh * hd, (hh + 1) * hd
            s = jax.lax.dot_general(qb[:, lo:hi], kb[:, lo:hi],
                                    (((1,), (1,)), ((), ())),
                                    preferred_element_type=f32)       # (T2, T2)
            s = s - jnp.max(s, axis=-1, keepdims=True)
            p = jnp.exp(s)
            p = p * pl.reciprocal(jnp.sum(p, axis=-1, keepdims=True), approx=True)
            ctx_parts.append(jnp.dot(p.astype(bf16), vb[:, lo:hi],
                                     preferred_element_type=f32))     # (T2, hd)
        # lane-concat heads -> one K=H output-projection matmul per layer
        ctx = jnp.concatenate(ctx_parts, axis=-1)                     # (T2, H)
        attn = (jnp.dot(ctx.astype(bf16), wo_ref[l], preferred_element_type=f32)
                + vec(base + OFF_BO, hidden))
        x = layer_norm(x + attn, vec(base + OFF_LN1_G, hidden),
                       vec(base + OFF_LN1_B, hidden))
        ff = (jnp.dot(x.astype(bf16), ff1_w_ref[l], preferred_element_type=f32)
              + vec(base + OFF_FF1_B, FFN))
        ff = jax.nn.gelu(ff, approximate=True)                        # (T2, F)
        ff = (jnp.dot(ff.astype(bf16), ff2_w_ref[l], preferred_element_type=f32)
              + vec(base + OFF_FF2_B, hidden))
        x = layer_norm(x + ff, vec(base + OFF_LN2_G, hidden),
                       vec(base + OFF_LN2_B, hidden))

    # ---- features[-1].mean(dim=1)
    out_ref[...] = jnp.mean(x, axis=0)[None, None, :]                 # (1, 1, H)


# ------------------------------ glue / wrapper -------------------------------

def unfold1d_static(x, k, stride):
    """im2col for the first 1-D conv.  x: [B, S] -> [B, T_out, k].
    Uses only static strided slices (no gather, no advanced indexing)."""
    _, s = x.shape
    t_out = (s - k) // stride + 1
    cols = [x[:, j:j + (t_out - 1) * stride + 1:stride] for j in range(k)]
    return jnp.stack(cols, axis=-1)


def hubert_encoder_forward(waveforms, params):
    # layout: waveforms [B, S] float32; single fused kernel, one program per batch item.
    b = waveforms.shape[0]
    p1 = unfold1d_static(waveforms, K1, STRIDE1)                      # [B, T1, K1]
    t1 = p1.shape[1]

    kernel = functools.partial(_hubert_fused_kernel, num_heads=NUM_HEADS,
                               num_layers=NUM_LAYERS, eps=EPS)

    def rep2(shape):   # weight replicated across the batch grid (2-D)
        return pl.BlockSpec(shape, lambda i: (0, 0))

    def rep3(shape):   # weight replicated across the batch grid (3-D, layer-stacked)
        return pl.BlockSpec(shape, lambda i: (0, 0, 0))

    out = pl.pallas_call(
        kernel,
        out_shape=jax.ShapeDtypeStruct((b, 1, HIDDEN), jnp.float32),
        grid=(b,),
        in_specs=[
            pl.BlockSpec((1, t1, K1), lambda i: (i, 0, 0)),           # patches
            rep2((SLAB_ROWS, SLAB_LANES)),                            # packed biases/gains
            rep2((K1, CONV_C)),                                       # conv1_w
            rep2((K2 * CONV_C, CONV_C)),                              # conv2_w
            rep2((CONV_C, HIDDEN)),                                   # proj_w
            rep3((NUM_LAYERS, HIDDEN, 3 * HIDDEN)),                   # wqkv
            rep3((NUM_LAYERS, HIDDEN, HIDDEN)),                       # wo
            rep3((NUM_LAYERS, HIDDEN, FFN)),                          # ff1_w
            rep3((NUM_LAYERS, FFN, HIDDEN)),                          # ff2_w
        ],
        out_specs=pl.BlockSpec((1, 1, HIDDEN), lambda i: (i, 0, 0)),
        scratch_shapes=[pltpu.VMEM((t1, CONV_C), jnp.float32)],       # conv-1 tap scratch
        compiler_params=pltpu.CompilerParams(
            dimension_semantics=("parallel",)),   # batch across v7x's 2 TCs
    )(p1,
      params["slab"],
      params["conv1_w"], params["conv2_w"], params["proj_w"],
      params["wqkv"], params["wo"], params["ff1_w"], params["ff2_w"])
    return out[:, 0, :]                                               # [B, HIDDEN]


def init_params(key):
    keys = iter(jax.random.split(key, 8))

    def w(shape):
        return jax.random.normal(next(keys), shape, jnp.float32) * 0.02

    hd = HIDDEN // NUM_HEADS
    bf16 = jnp.bfloat16

    # Fold the attention 1/sqrt(head_dim) scale into the Q columns of the fused
    # QKV weight (one-time weight preprocessing, bias rows are zero anyway).
    wqkv = w((NUM_LAYERS, HIDDEN, 3 * HIDDEN))
    wqkv = wqkv.at[:, :, :HIDDEN].multiply(1.0 / math.sqrt(hd))

    # Packed gain/bias slab: gains = 1, all biases = 0 (synthetic init).
    slab = jnp.zeros((SLAB_ROWS, SLAB_LANES), jnp.float32)
    slab = slab.at[ROW_GN_G, :CONV_C].set(1.0)
    slab = slab.at[ROW_FP_LN_G, :CONV_C].set(1.0)
    slab = slab.at[ROW_ENC_LN_G, :HIDDEN].set(1.0)
    for l in range(NUM_LAYERS):
        base = LAYER_BASE + l * PER_LAYER_ROWS
        slab = slab.at[base + OFF_LN1_G, :HIDDEN].set(1.0)
        slab = slab.at[base + OFF_LN2_G, :HIDDEN].set(1.0)

    return {
        "slab": slab,                                                 # f32
        # conv feature extractor (Conv1d bias=False -> no conv biases)
        "conv1_w": w((K1 * 1, CONV_C)).astype(bf16),
        "conv2_w": w((K2 * CONV_C, CONV_C)).astype(bf16),
        # feature projection
        "proj_w": w((CONV_C, HIDDEN)).astype(bf16),
        # transformer layers, stacked along a leading layer dim (fused QKV)
        "wqkv": wqkv.astype(bf16),
        "wo": w((NUM_LAYERS, HIDDEN, HIDDEN)).astype(bf16),
        "ff1_w": w((NUM_LAYERS, HIDDEN, FFN)).astype(bf16),
        "ff2_w": w((NUM_LAYERS, FFN, HIDDEN)).astype(bf16),
    }


if __name__ == "__main__":
    key = jax.random.PRNGKey(0)
    pkey, xkey = jax.random.split(key)
    params = init_params(pkey)
    waveforms = jax.random.normal(xkey, (2, SAMPLES), jnp.float32)    # [B, S]

    fwd = jax.jit(hubert_encoder_forward)
    out = jax.block_until_ready(fwd(waveforms, params))
    assert out.shape == (2, HIDDEN) and out.dtype == jnp.float32
    assert bool(jnp.all(jnp.isfinite(out)))
    print("KERNEL_OK")
</pallas_src>

<mosaic_0001>
module attributes {stable_mosaic.version = 11 : i64} {
  func.func @_hubert_fused_kernel(%arg0: i32, %arg1: memref<1x33x10xf32, #tpu.memory_space<vmem>>, %arg2: memref<24x128xf32, #tpu.memory_space<vmem>>, %arg3: memref<10x32xbf16, #tpu.memory_space<vmem>>, %arg4: memref<96x32xbf16, #tpu.memory_space<vmem>>, %arg5: memref<32x32xbf16, #tpu.memory_space<vmem>>, %arg6: memref<2x32x96xbf16, #tpu.memory_space<vmem>>, %arg7: memref<2x32x32xbf16, #tpu.memory_space<vmem>>, %arg8: memref<2x32x64xbf16, #tpu.memory_space<vmem>>, %arg9: memref<2x64x32xbf16, #tpu.memory_space<vmem>>, %arg10: memref<1x1x32xf32, #tpu.memory_space<vmem>>, %arg11: memref<33x32xf32, #tpu.memory_space<vmem>>) attributes {dimension_semantics = [#tpu.dimension_semantics<parallel>], iteration_bounds = array<i64: 2>, scalar_prefetch = 0 : i64, scratch_operands = 1 : i64, tpu.core_type = #tpu.core_type<tc>, window_params = [{transform_indices = @transform_0, window_bounds = array<i64: 1, 33, 10>}, {pipeline_mode = #tpu.pipeline_mode<synchronous>, transform_indices = @transform_1, window_bounds = array<i64: 24, 128>}, {pipeline_mode = #tpu.pipeline_mode<synchronous>, transform_indices = @transform_2, window_bounds = array<i64: 10, 32>}, {pipeline_mode = #tpu.pipeline_mode<synchronous>, transform_indices = @transform_3, window_bounds = array<i64: 96, 32>}, {pipeline_mode = #tpu.pipeline_mode<synchronous>, transform_indices = @transform_4, window_bounds = array<i64: 32, 32>}, {pipeline_mode = #tpu.pipeline_mode<synchronous>, transform_indices = @transform_5, window_bounds = array<i64: 2, 32, 96>}, {pipeline_mode = #tpu.pipeline_mode<synchronous>, transform_indices = @transform_6, window_bounds = array<i64: 2, 32, 32>}, {pipeline_mode = #tpu.pipeline_mode<synchronous>, transform_indices = @transform_7, window_bounds = array<i64: 2, 32, 64>}, {pipeline_mode = #tpu.pipeline_mode<synchronous>, transform_indices = @transform_8, window_bounds = array<i64: 2, 64, 32>}, {transform_indices = @transform_9, window_bounds = array<i64: 1, 1, 32>}]} {
    %c0 = arith.constant 0 : index
    %c0_0 = arith.constant 0 : index
    %c0_1 = arith.constant 0 : index
    %0 = vector.load %arg1[%c0, %c0_0, %c0_1] : memref<1x33x10xf32, #tpu.memory_space<vmem>>, vector<1x33x10xf32>
    %1 = vector.shape_cast %0 : vector<1x33x10xf32> to vector<33x10xf32>
    %2 = arith.truncf %1 : vector<33x10xf32> to vector<33x10xbf16>
    %c0_2 = arith.constant 0 : index
    %c0_3 = arith.constant 0 : index
    %3 = vector.load %arg3[%c0_2, %c0_3] : memref<10x32xbf16, #tpu.memory_space<vmem>>, vector<10x32xbf16>
    %cst = arith.constant dense<0.000000e+00> : vector<33x32xf32>
    %4 = tpu.matmul %2, %3, %cst {dimension_numbers = #tpu.dot_dimension_numbers<[1], [0], [0], [1], [0, 0, 1, 1], [], []>} : vector<33x10xbf16>, vector<10x32xbf16>, vector<33x32xf32> -> vector<33x32xf32>
    %cst_4 = arith.constant dense<0.000000e+00> : vector<32xf32>
    %5 = vector.multi_reduction <add>, %4, %cst_4 [0] : vector<33x32xf32> to vector<32xf32>
    %6 = vector.shape_cast %5 : vector<32xf32> to vector<1x32xf32>
    %cst_5 = arith.constant 3.300000e+01 : f32
    %7 = vector.broadcast %cst_5 : f32 to vector<1x32xf32>
    %8 = arith.divf %6, %7 : vector<1x32xf32>
    %9 = vector.broadcast %8 : vector<1x32xf32> to vector<33x32xf32>
    %10 = arith.subf %4, %9 : vector<33x32xf32>
    %11 = arith.mulf %10, %10 : vector<33x32xf32>
    %cst_6 = arith.constant dense<0.000000e+00> : vector<32xf32>
    %12 = vector.multi_reduction <add>, %11, %cst_6 [0] : vector<33x32xf32> to vector<32xf32>
    %13 = vector.shape_cast %12 : vector<32xf32> to vector<1x32xf32>
    %cst_7 = arith.constant 3.300000e+01 : f32
    %14 = vector.broadcast %cst_7 : f32 to vector<1x32xf32>
    %15 = arith.divf %13, %14 : vector<1x32xf32>
    %16 = vector.broadcast %8 : vector<1x32xf32> to vector<33x32xf32>
    %17 = arith.subf %4, %16 : vector<33x32xf32>
    %cst_8 = arith.constant 9.99999974E-6 : f32
    %18 = vector.broadcast %cst_8 : f32 to vector<1x32xf32>
    %19 = arith.addf %15, %18 : vector<1x32xf32>
    %20 = math.rsqrt %19 : vector<1x32xf32>
    %21 = vector.broadcast %20 : vector<1x32xf32> to vector<33x32xf32>
    %22 = arith.mulf %17, %21 : vector<33x32xf32>
    %c0_9 = arith.constant 0 : index
    %c0_10 = arith.constant 0 : index
    %23 = vector.load %arg2[%c0_9, %c0_10] : memref<24x128xf32, #tpu.memory_space<vmem>>, vector<1x32xf32>
    %24 = vector.broadcast %23 : vector<1x32xf32> to vector<33x32xf32>
    %25 = arith.mulf %22, %24 : vector<33x32xf32>
    %c1 = arith.constant 1 : index
    %c0_11 = arith.constant 0 : index
    %26 = vector.load %arg2[%c1, %c0_11] : memref<24x128xf32, #tpu.memory_space<vmem>>, vector<1x32xf32>
    %27 = vector.broadcast %26 : vector<1x32xf32> to vector<33x32xf32>
    %28 = arith.addf %25, %27 : vector<33x32xf32>
    %29 = arith.mulf %28, %28 : vector<33x32xf32>
    %30 = arith.mulf %28, %29 : vector<33x32xf32>
    %cst_12 = arith.constant 4.471500e-02 : f32
    %31 = vector.broadcast %cst_12 : f32 to vector<33x32xf32>
    %32 = arith.mulf %31, %30 : vector<33x32xf32>
    %33 = arith.addf %28, %32 : vector<33x32xf32>
    %cst_13 = arith.constant 0.797884583 : f32
    %34 = vector.broadcast %cst_13 : f32 to vector<33x32xf32>
    %35 = arith.mulf %34, %33 : vector<33x32xf32>
    %36 = math.tanh %35 : vector<33x32xf32>
    %cst_14 = arith.constant 1.000000e+00 : f32
    %37 = vector.broadcast %cst_14 : f32 to vector<33x32xf32>
    %38 = arith.addf %37, %36 : vector<33x32xf32>
    %cst_15 = arith.constant 5.000000e-01 : f32
    %39 = vector.broadcast %cst_15 : f32 to vector<33x32xf32>
    %40 = arith.mulf %39, %38 : vector<33x32xf32>
    %41 = arith.mulf %28, %40 : vector<33x32xf32>
    %c0_16 = arith.constant 0 : index
    %c0_17 = arith.constant 0 : index
    %42 = vector.load %arg11[%c0_16, %c0_17] : memref<33x32xf32, #tpu.memory_space<vmem>>, vector<33x32xf32>
    tpu.vector_store %arg11[%c0_16, %c0_17], %41 {strides = array<i32>} : memref<33x32xf32, #tpu.memory_space<vmem>>, vector<33x32xf32>,
    %c0_18 = arith.constant 0 : index
    %c0_19 = arith.constant 0 : index
    %43 = tpu.strided_load %arg11[%c0_18, %c0_19] {strides = array<i32: 2, 1>} : memref<33x32xf32, #tpu.memory_space<vmem>>, vector<16x32xf32>
    %c1_20 = arith.constant 1 : index
    %c0_21 = arith.constant 0 : index
    %44 = tpu.strided_load %arg11[%c1_20, %c0_21] {strides = array<i32: 2, 1>} : memref<33x32xf32, #tpu.memory_space<vmem>>, vector<16x32xf32>
    %c2 = arith.constant 2 : index
    %c0_22 = arith.constant 0 : index
    %45 = tpu.strided_load %arg11[%c2, %c0_22] {strides = array<i32: 2, 1>} : memref<33x32xf32, #tpu.memory_space<vmem>>, vector<16x32xf32>
    %46 = tpu.concatenate %43, %44, %45 in 1 : vector<16x32xf32>, vector<16x32xf32>, vector<16x32xf32> -> vector<16x96xf32>
    %47 = arith.truncf %46 : vector<16x96xf32> to vector<16x96xbf16>
    %c0_23 = arith.constant 0 : index
    %c0_24 = arith.constant 0 : index
    %48 = vector.load %arg4[%c0_23, %c0_24] : memref<96x32xbf16, #tpu.memory_space<vmem>>, vector<96x32xbf16>
    %cst_25 = arith.constant dense<0.000000e+00> : vector<16x32xf32>
    %49 = tpu.matmul %47, %48, %cst_25 {dimension_numbers = #tpu.dot_dimension_numbers<[1], [0], [0], [1], [0, 0, 1, 1], [], []>} : vector<16x96xbf16>, vector<96x32xbf16>, vector<16x32xf32> -> vector<16x32xf32>
    %50 = arith.mulf %49, %49 : vector<16x32xf32>
    %51 = arith.mulf %49, %50 : vector<16x32xf32>
    %cst_26 = arith.constant 4.471500e-02 : f32
    %52 = vector.broadcast %cst_26 : f32 to vector<16x32xf32>
    %53 = arith.mulf %52, %51 : vector<16x32xf32>
    %54 = arith.addf %49, %53 : vector<16x32xf32>
    %cst_27 = arith.constant 0.797884583 : f32
    %55 = vector.broadcast %cst_27 : f32 to vector<16x32xf32>
    %56 = arith.mulf %55, %54 : vector<16x32xf32>
    %57 = math.tanh %56 : vector<16x32xf32>
    %cst_28 = arith.constant 1.000000e+00 : f32
    %58 = vector.broadcast %cst_28 : f32 to vector<16x32xf32>
    %59 = arith.addf %58, %57 : vector<16x32xf32>
    %cst_29 = arith.constant 5.000000e-01 : f32
    %60 = vector.broadcast %cst_29 : f32 to vector<16x32xf32>
    %61 = arith.mulf %60, %59 : vector<16x32xf32>
    %62 = arith.mulf %49, %61 : vector<16x32xf32>
    %c2_30 = arith.constant 2 : index
    %c0_31 = arith.constant 0 : index
    %63 = vector.load %arg2[%c2_30, %c0_31] : memref<24x128xf32, #tpu.memory_space<vmem>>, vector<1x32xf32>
    %c3 = arith.constant 3 : index
    %c0_32 = arith.constant 0 : index
    %64 = vector.load %arg2[%c3, %c0_32] : memref<24x128xf32, #tpu.memory_space<vmem>>, vector<1x32xf32>
    %cst_33 = arith.constant dense<0.000000e+00> : vector<16xf32>
    %65 = vector.multi_reduction <add>, %62, %cst_33 [1] : vector<16x32xf32> to vector<16xf32>
    %66 = vector.shape_cast %65 : vector<16xf32> to vector<16x1xf32>
    %cst_34 = arith.constant 3.200000e+01 : f32
    %67 = vector.broadcast %cst_34 : f32 to vector<16x1xf32>
    %68 = arith.divf %66, %67 : vector<16x1xf32>
    %69 = vector.broadcast %68 : vector<16x1xf32> to vector<16x32xf32>
    %70 = arith.subf %62, %69 : vector<16x32xf32>
    %71 = arith.mulf %70, %70 : vector<16x32xf32>
    %cst_35 = arith.constant dense<0.000000e+00> : vector<16xf32>
    %72 = vector.multi_reduction <add>, %71, %cst_35 [1] : vector<16x32xf32> to vector<16xf32>
    %73 = vector.shape_cast %72 : vector<16xf32> to vector<16x1xf32>
    %cst_36 = arith.constant 3.200000e+01 : f32
    %74 = vector.broadcast %cst_36 : f32 to vector<16x1xf32>
    %75 = arith.divf %73, %74 : vector<16x1xf32>
    %76 = vector.broadcast %68 : vector<16x1xf32> to vector<16x32xf32>
    %77 = arith.subf %62, %76 : vector<16x32xf32>
    %cst_37 = arith.constant 9.99999974E-6 : f32
    %78 = vector.broadcast %cst_37 : f32 to vector<16x1xf32>
    %79 = arith.addf %75, %78 : vector<16x1xf32>
    %80 = math.rsqrt %79 : vector<16x1xf32>
    %81 = vector.broadcast %80 : vector<16x1xf32> to vector<16x32xf32>
    %82 = arith.mulf %77, %81 : vector<16x32xf32>
    %83 = vector.broadcast %63 : vector<1x32xf32> to vector<16x32xf32>
    %84 = arith.mulf %82, %83 : vector<16x32xf32>
    %85 = vector.broadcast %64 : vector<1x32xf32> to vector<16x32xf32>
    %86 = arith.addf %84, %85 : vector<16x32xf32>
    %87 = arith.truncf %86 : vector<16x32xf32> to vector<16x32xbf16>
    %c0_38 = arith.constant 0 : index
    %c0_39 = arith.constant 0 : index
    %88 = vector.load %arg5[%c0_38, %c0_39] : memref<32x32xbf16, #tpu.memory_space<vmem>>, vector<32x32xbf16>
    %cst_40 = arith.constant dense<0.000000e+00> : vector<16x32xf32>
    %89 = tpu.matmul %87, %88, %cst_40 {dimension_numbers = #tpu.dot_dimension_numbers<[1], [0], [0], [1], [0, 0, 1, 1], [], []>} : vector<16x32xbf16>, vector<32x32xbf16>, vector<16x32xf32> -> vector<16x32xf32>
    %c4 = arith.constant 4 : index
    %c0_41 = arith.constant 0 : index
    %90 = vector.load %arg2[%c4, %c0_41] : memref<24x128xf32, #tpu.memory_space<vmem>>, vector<1x32xf32>
    %91 = vector.broadcast %90 : vector<1x32xf32> to vector<16x32xf32>
    %92 = arith.addf %89, %91 : vector<16x32xf32>
    %c5 = arith.constant 5 : index
    %c0_42 = arith.constant 0 : index
    %93 = vector.load %arg2[%c5, %c0_42] : memref<24x128xf32, #tpu.memory_space<vmem>>, vector<1x32xf32>
    %c6 = arith.constant 6 : index
    %c0_43 = arith.constant 0 : index
    %94 = vector.load %arg2[%c6, %c0_43] : memref<24x128xf32, #tpu.memory_space<vmem>>, vector<1x32xf32>
    %cst_44 = arith.constant dense<0.000000e+00> : vector<16xf32>
    %95 = vector.multi_reduction <add>, %92, %cst_44 [1] : vector<16x32xf32> to vector<16xf32>
    %96 = vector.shape_cast %95 : vector<16xf32> to vector<16x1xf32>
    %cst_45 = arith.constant 3.200000e+01 : f32
    %97 = vector.broadcast %cst_45 : f32 to vector<16x1xf32>
    %98 = arith.divf %96, %97 : vector<16x1xf32>
    %99 = vector.broadcast %98 : vector<16x1xf32> to vector<16x32xf32>
    %100 = arith.subf %92, %99 : vector<16x32xf32>
    %101 = arith.mulf %100, %100 : vector<16x32xf32>
    %cst_46 = arith.constant dense<0.000000e+00> : vector<16xf32>
    %102 = vector.multi_reduction <add>, %101, %cst_46 [1] : vector<16x32xf32> to vector<16xf32>
    %103 = vector.shape_cast %102 : vector<16xf32> to vector<16x1xf32>
    %cst_47 = arith.constant 3.200000e+01 : f32
    %104 = vector.broadcast %cst_47 : f32 to vector<16x1xf32>
    %105 = arith.divf %103, %104 : vector<16x1xf32>
    %106 = vector.broadcast %98 : vector<16x1xf32> to vector<16x32xf32>
    %107 = arith.subf %92, %106 : vector<16x32xf32>
    %cst_48 = arith.constant 9.99999974E-6 : f32
    %108 = vector.broadcast %cst_48 : f32 to vector<16x1xf32>
    %109 = arith.addf %105, %108 : vector<16x1xf32>
    %110 = math.rsqrt %109 : vector<16x1xf32>
    %111 = vector.broadcast %110 : vector<16x1xf32> to vector<16x32xf32>
    %112 = arith.mulf %107, %111 : vector<16x32xf32>
    %113 = vector.broadcast %93 : vector<1x32xf32> to vector<16x32xf32>
    %114 = arith.mulf %112, %113 : vector<16x32xf32>
    %115 = vector.broadcast %94 : vector<1x32xf32> to vector<16x32xf32>
    %116 = arith.addf %114, %115 : vector<16x32xf32>
    %117 = arith.truncf %116 : vector<16x32xf32> to vector<16x32xbf16>
    %c0_49 = arith.constant 0 : index
    %c0_50 = arith.constant 0 : index
    %c0_51 = arith.constant 0 : index
    %118 = vector.load %arg6[%c0_49, %c0_50, %c0_51] : memref<2x32x96xbf16, #tpu.memory_space<vmem>>, vector<1x32x96xbf16>
    %119 = vector.shape_cast %118 : vector<1x32x96xbf16> to vector<32x96xbf16>
    %cst_52 = arith.constant dense<0.000000e+00> : vector<16x96xf32>
    %120 = tpu.matmul %117, %119, %cst_52 {dimension_numbers = #tpu.dot_dimension_numbers<[1], [0], [0], [1], [0, 0, 1, 1], [], []>} : vector<16x32xbf16>, vector<32x96xbf16>, vector<16x96xf32> -> vector<16x96xf32>
    %c7 = arith.constant 7 : index
    %c0_53 = arith.constant 0 : index
    %121 = vector.load %arg2[%c7, %c0_53] : memref<24x128xf32, #tpu.memory_space<vmem>>, vector<1x96xf32>
    %122 = vector.broadcast %121 : vector<1x96xf32> to vector<16x96xf32>
    %123 = arith.addf %120, %122 : vector<16x96xf32>
    %124 = vector.extract_strided_slice %123 {offsets = [0, 0], sizes = [16, 32], strides = [1, 1]} : vector<16x96xf32> to vector<16x32xf32>
    %125 = arith.truncf %124 : vector<16x32xf32> to vector<16x32xbf16>
    %126 = vector.extract_strided_slice %123 {offsets = [0, 32], sizes = [16, 32], strides = [1, 1]} : vector<16x96xf32> to vector<16x32xf32>
    %127 = arith.truncf %126 : vector<16x32xf32> to vector<16x32xbf16>
    %128 = vector.extract_strided_slice %123 {offsets = [0, 64], sizes = [16, 32], strides = [1, 1]} : vector<16x96xf32> to vector<16x32xf32>
    %129 = arith.truncf %128 : vector<16x32xf32> to vector<16x32xbf16>
    %130 = vector.extract_strided_slice %125 {offsets = [0, 0], sizes = [16, 8], strides = [1, 1]} : vector<16x32xbf16> to vector<16x8xbf16>
    %131 = vector.extract_strided_slice %127 {offsets = [0, 0], sizes = [16, 8], strides = [1, 1]} : vector<16x32xbf16> to vector<16x8xbf16>
    %cst_54 = arith.constant dense<0.000000e+00> : vector<16x16xf32>
    %132 = tpu.matmul %130, %131, %cst_54 {dimension_numbers = #tpu.dot_dimension_numbers<[1], [1], [0], [0], [0, 0, 1, 0], [], []>} : vector<16x8xbf16>, vector<16x8xbf16>, vector<16x16xf32> -> vector<16x16xf32>
    %cst_55 = arith.constant dense<0xFF800000> : vector<16xf32>
    %133 = vector.multi_reduction <maximumf>, %132, %cst_55 [1] : vector<16x16xf32> to vector<16xf32>
    %134 = vector.shape_cast %133 : vector<16xf32> to vector<16x1xf32>
    %135 = vector.broadcast %134 : vector<16x1xf32> to vector<16x16xf32>
    %136 = arith.subf %132, %135 : vector<16x16xf32>
    %137 = math.exp %136 : vector<16x16xf32>
    %cst_56 = arith.constant dense<0.000000e+00> : vector<16xf32>
    %138 = vector.multi_reduction <add>, %137, %cst_56 [1] : vector<16x16xf32> to vector<16xf32>
    %139 = vector.shape_cast %138 : vector<16xf32> to vector<16x1xf32>
    %140 = tpu.reciprocal %139 {approx = true} : vector<16x1xf32> -> vector<16x1xf32>
    %141 = vector.broadcast %140 : vector<16x1xf32> to vector<16x16xf32>
    %142 = arith.mulf %137, %141 : vector<16x16xf32>
    %143 = arith.truncf %142 : vector<16x16xf32> to vector<16x16xbf16>
    %144 = vector.extract_strided_slice %129 {offsets = [0, 0], sizes = [16, 8], strides = [1, 1]} : vector<16x32xbf16> to vector<16x8xbf16>
    %cst_57 = arith.constant dense<0.000000e+00> : vector<16x8xf32>
    %145 = tpu.matmul %143, %144, %cst_57 {dimension_numbers = #tpu.dot_dimension_numbers<[1], [0], [0], [1], [0, 0, 1, 1], [], []>} : vector<16x16xbf16>, vector<16x8xbf16>, vector<16x8xf32> -> vector<16x8xf32>
    %146 = vector.extract_strided_slice %125 {offsets = [0, 8], sizes = [16, 8], strides = [1, 1]} : vector<16x32xbf16> to vector<16x8xbf16>
    %147 = vector.extract_strided_slice %127 {offsets = [0, 8], sizes = [16, 8], strides = [1, 1]} : vector<16x32xbf16> to vector<16x8xbf16>
    %cst_58 = arith.constant dense<0.000000e+00> : vector<16x16xf32>
    %148 = tpu.matmul %146, %147, %cst_58 {dimension_numbers = #tpu.dot_dimension_numbers<[1], [1], [0], [0], [0, 0, 1, 0], [], []>} : vector<16x8xbf16>, vector<16x8xbf16>, vector<16x16xf32> -> vector<16x16xf32>
    %cst_59 = arith.constant dense<0xFF800000> : vector<16xf32>
    %149 = vector.multi_reduction <maximumf>, %148, %cst_59 [1] : vector<16x16xf32> to vector<16xf32>
    %150 = vector.shape_cast %149 : vector<16xf32> to vector<16x1xf32>
    %151 = vector.broadcast %150 : vector<16x1xf32> to vector<16x16xf32>
    %152 = arith.subf %148, %151 : vector<16x16xf32>
    %153 = math.exp %152 : vector<16x16xf32>
    %cst_60 = arith.constant dense<0.000000e+00> : vector<16xf32>
    %154 = vector.multi_reduction <add>, %153, %cst_60 [1] : vector<16x16xf32> to vector<16xf32>
    %155 = vector.shape_cast %154 : vector<16xf32> to vector<16x1xf32>
    %156 = tpu.reciprocal %155 {approx = true} : vector<16x1xf32> -> vector<16x1xf32>
    %157 = vector.broadcast %156 : vector<16x1xf32> to vector<16x16xf32>
    %158 = arith.mulf %153, %157 : vector<16x16xf32>
    %159 = arith.truncf %158 : vector<16x16xf32> to vector<16x16xbf16>
    %160 = vector.extract_strided_slice %129 {offsets = [0, 8], sizes = [16, 8], strides = [1, 1]} : vector<16x32xbf16> to vector<16x8xbf16>
    %cst_61 = arith.constant dense<0.000000e+00> : vector<16x8xf32>
    %161 = tpu.matmul %159, %160, %cst_61 {dimension_numbers = #tpu.dot_dimension_numbers<[1], [0], [0], [1], [0, 0, 1, 1], [], []>} : vector<16x16xbf16>, vector<16x8xbf16>, vector<16x8xf32> -> vector<16x8xf32>
    %162 = vector.extract_strided_slice %125 {offsets = [0, 16], sizes = [16, 8], strides = [1, 1]} : vector<16x32xbf16> to vector<16x8xbf16>
    %163 = vector.extract_strided_slice %127 {offsets = [0, 16], sizes = [16, 8], strides = [1, 1]} : vector<16x32xbf16> to vector<16x8xbf16>
    %cst_62 = arith.constant dense<0.000000e+00> : vector<16x16xf32>
    %164 = tpu.matmul %162, %163, %cst_62 {dimension_numbers = #tpu.dot_dimension_numbers<[1], [1], [0], [0], [0, 0, 1, 0], [], []>} : vector<16x8xbf16>, vector<16x8xbf16>, vector<16x16xf32> -> vector<16x16xf32>
    %cst_63 = arith.constant dense<0xFF800000> : vector<16xf32>
    %165 = vector.multi_reduction <maximumf>, %164, %cst_63 [1] : vector<16x16xf32> to vector<16xf32>
    %166 = vector.shape_cast %165 : vector<16xf32> to vector<16x1xf32>
    %167 = vector.broadcast %166 : vector<16x1xf32> to vector<16x16xf32>
    %168 = arith.subf %164, %167 : vector<16x16xf32>
    %169 = math.exp %168 : vector<16x16xf32>
    %cst_64 = arith.constant dense<0.000000e+00> : vector<16xf32>
    %170 = vector.multi_reduction <add>, %169, %cst_64 [1] : vector<16x16xf32> to vector<16xf32>
    %171 = vector.shape_cast %170 : vector<16xf32> to vector<16x1xf32>
    %172 = tpu.reciprocal %171 {approx = true} : vector<16x1xf32> -> vector<16x1xf32>
    %173 = vector.broadcast %172 : vector<16x1xf32> to vector<16x16xf32>
    %174 = arith.mulf %169, %173 : vector<16x16xf32>
    %175 = arith.truncf %174 : vector<16x16xf32> to vector<16x16xbf16>
    %176 = vector.extract_strided_slice %129 {offsets = [0, 16], sizes = [16, 8], strides = [1, 1]} : vector<16x32xbf16> to vector<16x8xbf16>
    %cst_65 = arith.constant dense<0.000000e+00> : vector<16x8xf32>
    %177 = tpu.matmul %175, %176, %cst_65 {dimension_numbers = #tpu.dot_dimension_numbers<[1], [0], [0], [1], [0, 0, 1, 1], [], []>} : vector<16x16xbf16>, vector<16x8xbf16>, vector<16x8xf32> -> vector<16x8xf32>
    %178 = vector.extract_strided_slice %125 {offsets = [0, 24], sizes = [16, 8], strides = [1, 1]} : vector<16x32xbf16> to vector<16x8xbf16>
    %179 = vector.extract_strided_slice %127 {offsets = [0, 24], sizes = [16, 8], strides = [1, 1]} : vector<16x32xbf16> to vector<16x8xbf16>
    %cst_66 = arith.constant dense<0.000000e+00> : vector<16x16xf32>
    %180 = tpu.matmul %178, %179, %cst_66 {dimension_numbers = #tpu.dot_dimension_numbers<[1], [1], [0], [0], [0, 0, 1, 0], [], []>} : vector<16x8xbf16>, vector<16x8xbf16>, vector<16x16xf32> -> vector<16x16xf32>
    %cst_67 = arith.constant dense<0xFF800000> : vector<16xf32>
    %181 = vector.multi_reduction <maximumf>, %180, %cst_67 [1] : vector<16x16xf32> to vector<16xf32>
    %182 = vector.shape_cast %181 : vector<16xf32> to vector<16x1xf32>
    %183 = vector.broadcast %182 : vector<16x1xf32> to vector<16x16xf32>
    %184 = arith.subf %180, %183 : vector<16x16xf32>
    %185 = math.exp %184 : vector<16x16xf32>
    %cst_68 = arith.constant dense<0.000000e+00> : vector<16xf32>
    %186 = vector.multi_reduction <add>, %185, %cst_68 [1] : vector<16x16xf32> to vector<16xf32>
    %187 = vector.shape_cast %186 : vector<16xf32> to vector<16x1xf32>
    %188 = tpu.reciprocal %187 {approx = true} : vector<16x1xf32> -> vector<16x1xf32>
    %189 = vector.broadcast %188 : vector<16x1xf32> to vector<16x16xf32>
    %190 = arith.mulf %185, %189 : vector<16x16xf32>
    %191 = arith.truncf %190 : vector<16x16xf32> to vector<16x16xbf16>
    %192 = vector.extract_strided_slice %129 {offsets = [0, 24], sizes = [16, 8], strides = [1, 1]} : vector<16x32xbf16> to vector<16x8xbf16>
    %cst_69 = arith.constant dense<0.000000e+00> : vector<16x8xf32>
    %193 = tpu.matmul %191, %192, %cst_69 {dimension_numbers = #tpu.dot_dimension_numbers<[1], [0], [0], [1], [0, 0, 1, 1], [], []>} : vector<16x16xbf16>, vector<16x8xbf16>, vector<16x8xf32> -> vector<16x8xf32>
    %194 = tpu.concatenate %145, %161, %177, %193 in 1 : vector<16x8xf32>, vector<16x8xf32>, vector<16x8xf32>, vector<16x8xf32> -> vector<16x32xf32>
    %195 = arith.truncf %194 : vector<16x32xf32> to vector<16x32xbf16>
    %c0_70 = arith.constant 0 : index
    %c0_71 = arith.constant 0 : index
    %c0_72 = arith.constant 0 : index
    %196 = vector.load %arg7[%c0_70, %c0_71, %c0_72] : memref<2x32x32xbf16, #tpu.memory_space<vmem>>, vector<1x32x32xbf16>
    %197 = vector.shape_cast %196 : vector<1x32x32xbf16> to vector<32x32xbf16>
    %cst_73 = arith.constant dense<0.000000e+00> : vector<16x32xf32>
    %198 = tpu.matmul %195, %197, %cst_73 {dimension_numbers = #tpu.dot_dimension_numbers<[1], [0], [0], [1], [0, 0, 1, 1], [], []>} : vector<16x32xbf16>, vector<32x32xbf16>, vector<16x32xf32> -> vector<16x32xf32>
    %c8 = arith.constant 8 : index
    %c0_74 = arith.constant 0 : index
    %199 = vector.load %arg2[%c8, %c0_74] : memref<24x128xf32, #tpu.memory_space<vmem>>, vector<1x32xf32>
    %200 = vector.broadcast %199 : vector<1x32xf32> to vector<16x32xf32>
    %201 = arith.addf %198, %200 : vector<16x32xf32>
    %202 = arith.addf %116, %201 : vector<16x32xf32>
    %c9 = arith.constant 9 : index
    %c0_75 = arith.constant 0 : index
    %203 = vector.load %arg2[%c9, %c0_75] : memref<24x128xf32, #tpu.memory_space<vmem>>, vector<1x32xf32>
    %c10 = arith.constant 10 : index
    %c0_76 = arith.constant 0 : index
    %204 = vector.load %arg2[%c10, %c0_76] : memref<24x128xf32, #tpu.memory_space<vmem>>, vector<1x32xf32>
    %cst_77 = arith.constant dense<0.000000e+00> : vector<16xf32>
    %205 = vector.multi_reduction <add>, %202, %cst_77 [1] : vector<16x32xf32> to vector<16xf32>
    %206 = vector.shape_cast %205 : vector<16xf32> to vector<16x1xf32>
    %cst_78 = arith.constant 3.200000e+01 : f32
    %207 = vector.broadcast %cst_78 : f32 to vector<16x1xf32>
    %208 = arith.divf %206, %207 : vector<16x1xf32>
    %209 = vector.broadcast %208 : vector<16x1xf32> to vector<16x32xf32>
    %210 = arith.subf %202, %209 : vector<16x32xf32>
    %211 = arith.mulf %210, %210 : vector<16x32xf32>
    %cst_79 = arith.constant dense<0.000000e+00> : vector<16xf32>
    %212 = vector.multi_reduction <add>, %211, %cst_79 [1] : vector<16x32xf32> to vector<16xf32>
    %213 = vector.shape_cast %212 : vector<16xf32> to vector<16x1xf32>
    %cst_80 = arith.constant 3.200000e+01 : f32
    %214 = vector.broadcast %cst_80 : f32 to vector<16x1xf32>
    %215 = arith.divf %213, %214 : vector<16x1xf32>
    %216 = vector.broadcast %208 : vector<16x1xf32> to vector<16x32xf32>
    %217 = arith.subf %202, %216 : vector<16x32xf32>
    %cst_81 = arith.constant 9.99999974E-6 : f32
    %218 = vector.broadcast %cst_81 : f32 to vector<16x1xf32>
    %219 = arith.addf %215, %218 : vector<16x1xf32>
    %220 = math.rsqrt %219 : vector<16x1xf32>
    %221 = vector.broadcast %220 : vector<16x1xf32> to vector<16x32xf32>
    %222 = arith.mulf %217, %221 : vector<16x32xf32>
    %223 = vector.broadcast %203 : vector<1x32xf32> to vector<16x32xf32>
    %224 = arith.mulf %222, %223 : vector<16x32xf32>
    %225 = vector.broadcast %204 : vector<1x32xf32> to vector<16x32xf32>
    %226 = arith.addf %224, %225 : vector<16x32xf32>
    %227 = arith.truncf %226 : vector<16x32xf32> to vector<16x32xbf16>
    %c0_82 = arith.constant 0 : index
    %c0_83 = arith.constant 0 : index
    %c0_84 = arith.constant 0 : index
    %228 = vector.load %arg8[%c0_82, %c0_83, %c0_84] : memref<2x32x64xbf16, #tpu.memory_space<vmem>>, vector<1x32x64xbf16>
    %229 = vector.shape_cast %228 : vector<1x32x64xbf16> to vector<32x64xbf16>
    %cst_85 = arith.constant dense<0.000000e+00> : vector<16x64xf32>
    %230 = tpu.matmul %227, %229, %cst_85 {dimension_numbers = #tpu.dot_dimension_numbers<[1], [0], [0], [1], [0, 0, 1, 1], [], []>} : vector<16x32xbf16>, vector<32x64xbf16>, vector<16x64xf32> -> vector<16x64xf32>
    %c11 = arith.constant 11 : index
    %c0_86 = arith.constant 0 : index
    %231 = vector.load %arg2[%c11, %c0_86] : memref<24x128xf32, #tpu.memory_space<vmem>>, vector<1x64xf32>
    %232 = vector.broadcast %231 : vector<1x64xf32> to vector<16x64xf32>
    %233 = arith.addf %230, %232 : vector<16x64xf32>
    %234 = arith.mulf %233, %233 : vector<16x64xf32>
    %235 = arith.mulf %233, %234 : vector<16x64xf32>
    %cst_87 = arith.constant 4.471500e-02 : f32
    %236 = vector.broadcast %cst_87 : f32 to vector<16x64xf32>
    %237 = arith.mulf %236, %235 : vector<16x64xf32>
    %238 = arith.addf %233, %237 : vector<16x64xf32>
    %cst_88 = arith.constant 0.797884583 : f32
    %239 = vector.broadcast %cst_88 : f32 to vector<16x64xf32>
    %240 = arith.mulf %239, %238 : vector<16x64xf32>
    %241 = math.tanh %240 : vector<16x64xf32>
    %cst_89 = arith.constant 1.000000e+00 : f32
    %242 = vector.broadcast %cst_89 : f32 to vector<16x64xf32>
    %243 = arith.addf %242, %241 : vector<16x64xf32>
    %cst_90 = arith.constant 5.000000e-01 : f32
    %244 = vector.broadcast %cst_90 : f32 to vector<16x64xf32>
    %245 = arith.mulf %244, %243 : vector<16x64xf32>
    %246 = arith.mulf %233, %245 : vector<16x64xf32>
    %247 = arith.truncf %246 : vector<16x64xf32> to vector<16x64xbf16>
    %c0_91 = arith.constant 0 : index
    %c0_92 = arith.constant 0 : index
    %c0_93 = arith.constant 0 : index
    %248 = vector.load %arg9[%c0_91, %c0_92, %c0_93] : memref<2x64x32xbf16, #tpu.memory_space<vmem>>, vector<1x64x32xbf16>
    %249 = vector.shape_cast %248 : vector<1x64x32xbf16> to vector<64x32xbf16>
    %cst_94 = arith.constant dense<0.000000e+00> : vector<16x32xf32>
    %250 = tpu.matmul %247, %249, %cst_94 {dimension_numbers = #tpu.dot_dimension_numbers<[1], [0], [0], [1], [0, 0, 1, 1], [], []>} : vector<16x64xbf16>, vector<64x32xbf16>, vector<16x32xf32> -> vector<16x32xf32>
    %c12 = arith.constant 12 : index
    %c0_95 = arith.constant 0 : index
    %251 = vector.load %arg2[%c12, %c0_95] : memref<24x128xf32, #tpu.memory_space<vmem>>, vector<1x32xf32>
    %252 = vector.broadcast %251 : vector<1x32xf32> to vector<16x32xf32>
    %253 = arith.addf %250, %252 : vector<16x32xf32>
    %254 = arith.addf %226, %253 : vector<16x32xf32>
    %c13 = arith.constant 13 : index
    %c0_96 = arith.constant 0 : index
    %255 = vector.load %arg2[%c13, %c0_96] : memref<24x128xf32, #tpu.memory_space<vmem>>, vector<1x32xf32>
    %c14 = arith.constant 14 : index
    %c0_97 = arith.constant 0 : index
    %256 = vector.load %arg2[%c14, %c0_97] : memref<24x128xf32, #tpu.memory_space<vmem>>, vector<1x32xf32>
    %cst_98 = arith.constant dense<0.000000e+00> : vector<16xf32>
    %257 = vector.multi_reduction <add>, %254, %cst_98 [1] : vector<16x32xf32> to vector<16xf32>
    %258 = vector.shape_cast %257 : vector<16xf32> to vector<16x1xf32>
    %cst_99 = arith.constant 3.200000e+01 : f32
    %259 = vector.broadcast %cst_99 : f32 to vector<16x1xf32>
    %260 = arith.divf %258, %259 : vector<16x1xf32>
    %261 = vector.broadcast %260 : vector<16x1xf32> to vector<16x32xf32>
    %262 = arith.subf %254, %261 : vector<16x32xf32>
    %263 = arith.mulf %262, %262 : vector<16x32xf32>
    %cst_100 = arith.constant dense<0.000000e+00> : vector<16xf32>
    %264 = vector.multi_reduction <add>, %263, %cst_100 [1] : vector<16x32xf32> to vector<16xf32>
    %265 = vector.shape_cast %264 : vector<16xf32> to vector<16x1xf32>
    %cst_101 = arith.constant 3.200000e+01 : f32
    %266 = vector.broadcast %cst_101 : f32 to vector<16x1xf32>
    %267 = arith.divf %265, %266 : vector<16x1xf32>
    %268 = vector.broadcast %260 : vector<16x1xf32> to vector<16x32xf32>
    %269 = arith.subf %254, %268 : vector<16x32xf32>
    %cst_102 = arith.constant 9.99999974E-6 : f32
    %270 = vector.broadcast %cst_102 : f32 to vector<16x1xf32>
    %271 = arith.addf %267, %270 : vector<16x1xf32>
    %272 = math.rsqrt %271 : vector<16x1xf32>
    %273 = vector.broadcast %272 : vector<16x1xf32> to vector<16x32xf32>
    %274 = arith.mulf %269, %273 : vector<16x32xf32>
    %275 = vector.broadcast %255 : vector<1x32xf32> to vector<16x32xf32>
    %276 = arith.mulf %274, %275 : vector<16x32xf32>
    %277 = vector.broadcast %256 : vector<1x32xf32> to vector<16x32xf32>
    %278 = arith.addf %276, %277 : vector<16x32xf32>
    %279 = arith.truncf %278 : vector<16x32xf32> to vector<16x32xbf16>
    %c1_103 = arith.constant 1 : index
    %c0_104 = arith.constant 0 : index
    %c0_105 = arith.constant 0 : index
    %280 = vector.load %arg6[%c1_103, %c0_104, %c0_105] : memref<2x32x96xbf16, #tpu.memory_space<vmem>>, vector<1x32x96xbf16>
    %281 = vector.shape_cast %280 : vector<1x32x96xbf16> to vector<32x96xbf16>
    %cst_106 = arith.constant dense<0.000000e+00> : vector<16x96xf32>
    %282 = tpu.matmul %279, %281, %cst_106 {dimension_numbers = #tpu.dot_dimension_numbers<[1], [0], [0], [1], [0, 0, 1, 1], [], []>} : vector<16x32xbf16>, vector<32x96xbf16>, vector<16x96xf32> -> vector<16x96xf32>
    %c15 = arith.constant 15 : index
    %c0_107 = arith.constant 0 : index
    %283 = vector.load %arg2[%c15, %c0_107] : memref<24x128xf32, #tpu.memory_space<vmem>>, vector<1x96xf32>
    %284 = vector.broadcast %283 : vector<1x96xf32> to vector<16x96xf32>
    %285 = arith.addf %282, %284 : vector<16x96xf32>
    %286 = vector.extract_strided_slice %285 {offsets = [0, 0], sizes = [16, 32], strides = [1, 1]} : vector<16x96xf32> to vector<16x32xf32>
    %287 = arith.truncf %286 : vector<16x32xf32> to vector<16x32xbf16>
    %288 = vector.extract_strided_slice %285 {offsets = [0, 32], sizes = [16, 32], strides = [1, 1]} : vector<16x96xf32> to vector<16x32xf32>
    %289 = arith.truncf %288 : vector<16x32xf32> to vector<16x32xbf16>
    %290 = vector.extract_strided_slice %285 {offsets = [0, 64], sizes = [16, 32], strides = [1, 1]} : vector<16x96xf32> to vector<16x32xf32>
    %291 = arith.truncf %290 : vector<16x32xf32> to vector<16x32xbf16>
    %292 = vector.extract_strided_slice %287 {offsets = [0, 0], sizes = [16, 8], strides = [1, 1]} : vector<16x32xbf16> to vector<16x8xbf16>
    %293 = vector.extract_strided_slice %289 {offsets = [0, 0], sizes = [16, 8], strides = [1, 1]} : vector<16x32xbf16> to vector<16x8xbf16>
    %cst_108 = arith.constant dense<0.000000e+00> : vector<16x16xf32>
    %294 = tpu.matmul %292, %293, %cst_108 {dimension_numbers = #tpu.dot_dimension_numbers<[1], [1], [0], [0], [0, 0, 1, 0], [], []>} : vector<16x8xbf16>, vector<16x8xbf16>, vector<16x16xf32> -> vector<16x16xf32>
    %cst_109 = arith.constant dense<0xFF800000> : vector<16xf32>
    %295 = vector.multi_reduction <maximumf>, %294, %cst_109 [1] : vector<16x16xf32> to vector<16xf32>
    %296 = vector.shape_cast %295 : vector<16xf32> to vector<16x1xf32>
    %297 = vector.broadcast %296 : vector<16x1xf32> to vector<16x16xf32>
    %298 = arith.subf %294, %297 : vector<16x16xf32>
    %299 = math.exp %298 : vector<16x16xf32>
    %cst_110 = arith.constant dense<0.000000e+00> : vector<16xf32>
    %300 = vector.multi_reduction <add>, %299, %cst_110 [1] : vector<16x16xf32> to vector<16xf32>
    %301 = vector.shape_cast %300 : vector<16xf32> to vector<16x1xf32>
    %302 = tpu.reciprocal %301 {approx = true} : vector<16x1xf32> -> vector<16x1xf32>
    %303 = vector.broadcast %302 : vector<16x1xf32> to vector<16x16xf32>
    %304 = arith.mulf %299, %303 : vector<16x16xf32>
    %305 = arith.truncf %304 : vector<16x16xf32> to vector<16x16xbf16>
    %306 = vector.extract_strided_slice %291 {offsets = [0, 0], sizes = [16, 8], strides = [1, 1]} : vector<16x32xbf16> to vector<16x8xbf16>
    %cst_111 = arith.constant dense<0.000000e+00> : vector<16x8xf32>
    %307 = tpu.matmul %305, %306, %cst_111 {dimension_numbers = #tpu.dot_dimension_numbers<[1], [0], [0], [1], [0, 0, 1, 1], [], []>} : vector<16x16xbf16>, vector<16x8xbf16>, vector<16x8xf32> -> vector<16x8xf32>
    %308 = vector.extract_strided_slice %287 {offsets = [0, 8], sizes = [16, 8], strides = [1, 1]} : vector<16x32xbf16> to vector<16x8xbf16>
    %309 = vector.extract_strided_slice %289 {offsets = [0, 8], sizes = [16, 8], strides = [1, 1]} : vector<16x32xbf16> to vector<16x8xbf16>
    %cst_112 = arith.constant dense<0.000000e+00> : vector<16x16xf32>
    %310 = tpu.matmul %308, %309, %cst_112 {dimension_numbers = #tpu.dot_dimension_numbers<[1], [1], [0], [0], [0, 0, 1, 0], [], []>} : vector<16x8xbf16>, vector<16x8xbf16>, vector<16x16xf32> -> vector<16x16xf32>
    %cst_113 = arith.constant dense<0xFF800000> : vector<16xf32>
    %311 = vector.multi_reduction <maximumf>, %310, %cst_113 [1] : vector<16x16xf32> to vector<16xf32>
    %312 = vector.shape_cast %311 : vector<16xf32> to vector<16x1xf32>
    %313 = vector.broadcast %312 : vector<16x1xf32> to vector<16x16xf32>
    %314 = arith.subf %310, %313 : vector<16x16xf32>
    %315 = math.exp %314 : vector<16x16xf32>
    %cst_114 = arith.constant dense<0.000000e+00> : vector<16xf32>
    %316 = vector.multi_reduction <add>, %315, %cst_114 [1] : vector<16x16xf32> to vector<16xf32>
    %317 = vector.shape_cast %316 : vector<16xf32> to vector<16x1xf32>
    %318 = tpu.reciprocal %317 {approx = true} : vector<16x1xf32> -> vector<16x1xf32>
    %319 = vector.broadcast %318 : vector<16x1xf32> to vector<16x16xf32>
    %320 = arith.mulf %315, %319 : vector<16x16xf32>
    %321 = arith.truncf %320 : vector<16x16xf32> to vector<16x16xbf16>
    %322 = vector.extract_strided_slice %291 {offsets = [0, 8], sizes = [16, 8], strides = [1, 1]} : vector<16x32xbf16> to vector<16x8xbf16>
    %cst_115 = arith.constant dense<0.000000e+00> : vector<16x8xf32>
    %323 = tpu.matmul %321, %322, %cst_115 {dimension_numbers = #tpu.dot_dimension_numbers<[1], [0], [0], [1], [0, 0, 1, 1], [], []>} : vector<16x16xbf16>, vector<16x8xbf16>, vector<16x8xf32> -> vector<16x8xf32>
    %324 = vector.extract_strided_slice %287 {offsets = [0, 16], sizes = [16, 8], strides = [1, 1]} : vector<16x32xbf16> to vector<16x8xbf16>
    %325 = vector.extract_strided_slice %289 {offsets = [0, 16], sizes = [16, 8], strides = [1, 1]} : vector<16x32xbf16> to vector<16x8xbf16>
    %cst_116 = arith.constant dense<0.000000e+00> : vector<16x16xf32>
    %326 = tpu.matmul %324, %325, %cst_116 {dimension_numbers = #tpu.dot_dimension_numbers<[1], [1], [0], [0], [0, 0, 1, 0], [], []>} : vector<16x8xbf16>, vector<16x8xbf16>, vector<16x16xf32> -> vector<16x16xf32>
    %cst_117 = arith.constant dense<0xFF800000> : vector<16xf32>
    %327 = vector.multi_reduction <maximumf>, %326, %cst_117 [1] : vector<16x16xf32> to vector<16xf32>
    %328 = vector.shape_cast %327 : vector<16xf32> to vector<16x1xf32>
    %329 = vector.broadcast %328 : vector<16x1xf32> to vector<16x16xf32>
    %330 = arith.subf %326, %329 : vector<16x16xf32>
    %331 = math.exp %330 : vector<16x16xf32>
    %cst_118 = arith.constant dense<0.000000e+00> : vector<16xf32>
    %332 = vector.multi_reduction <add>, %331, %cst_118 [1] : vector<16x16xf32> to vector<16xf32>
    %333 = vector.shape_cast %332 : vector<16xf32> to vector<16x1xf32>
    %334 = tpu.reciprocal %333 {approx = true} : vector<16x1xf32> -> vector<16x1xf32>
    %335 = vector.broadcast %334 : vector<16x1xf32> to vector<16x16xf32>
    %336 = arith.mulf %331, %335 : vector<16x16xf32>
    %337 = arith.truncf %336 : vector<16x16xf32> to vector<16x16xbf16>
    %338 = vector.extract_strided_slice %291 {offsets = [0, 16], sizes = [16, 8], strides = [1, 1]} : vector<16x32xbf16> to vector<16x8xbf16>
    %cst_119 = arith.constant dense<0.000000e+00> : vector<16x8xf32>
    %339 = tpu.matmul %337, %338, %cst_119 {dimension_numbers = #tpu.dot_dimension_numbers<[1], [0], [0], [1], [0, 0, 1, 1], [], []>} : vector<16x16xbf16>, vector<16x8xbf16>, vector<16x8xf32> -> vector<16x8xf32>
    %340 = vector.extract_strided_slice %287 {offsets = [0, 24], sizes = [16, 8], strides = [1, 1]} : vector<16x32xbf16> to vector<16x8xbf16>
    %341 = vector.extract_strided_slice %289 {offsets = [0, 24], sizes = [16, 8], strides = [1, 1]} : vector<16x32xbf16> to vector<16x8xbf16>
    %cst_120 = arith.constant dense<0.000000e+00> : vector<16x16xf32>
    %342 = tpu.matmul %340, %341, %cst_120 {dimension_numbers = #tpu.dot_dimension_numbers<[1], [1], [0], [0], [0, 0, 1, 0], [], []>} : vector<16x8xbf16>, vector<16x8xbf16>, vector<16x16xf32> -> vector<16x16xf32>
    %cst_121 = arith.constant dense<0xFF800000> : vector<16xf32>
    %343 = vector.multi_reduction <maximumf>, %342, %cst_121 [1] : vector<16x16xf32> to vector<16xf32>
    %344 = vector.shape_cast %343 : vector<16xf32> to vector<16x1xf32>
    %345 = vector.broadcast %344 : vector<16x1xf32> to vector<16x16xf32>
    %346 = arith.subf %342, %345 : vector<16x16xf32>
    %347 = math.exp %346 : vector<16x16xf32>
    %cst_122 = arith.constant dense<0.000000e+00> : vector<16xf32>
    %348 = vector.multi_reduction <add>, %347, %cst_122 [1] : vector<16x16xf32> to vector<16xf32>
    %349 = vector.shape_cast %348 : vector<16xf32> to vector<16x1xf32>
    %350 = tpu.reciprocal %349 {approx = true} : vector<16x1xf32> -> vector<16x1xf32>
    %351 = vector.broadcast %350 : vector<16x1xf32> to vector<16x16xf32>
    %352 = arith.mulf %347, %351 : vector<16x16xf32>
    %353 = arith.truncf %352 : vector<16x16xf32> to vector<16x16xbf16>
    %354 = vector.extract_strided_slice %291 {offsets = [0, 24], sizes = [16, 8], strides = [1, 1]} : vector<16x32xbf16> to vector<16x8xbf16>
    %cst_123 = arith.constant dense<0.000000e+00> : vector<16x8xf32>
    %355 = tpu.matmul %353, %354, %cst_123 {dimension_numbers = #tpu.dot_dimension_numbers<[1], [0], [0], [1], [0, 0, 1, 1], [], []>} : vector<16x16xbf16>, vector<16x8xbf16>, vector<16x8xf32> -> vector<16x8xf32>
    %356 = tpu.concatenate %307, %323, %339, %355 in 1 : vector<16x8xf32>, vector<16x8xf32>, vector<16x8xf32>, vector<16x8xf32> -> vector<16x32xf32>
    %357 = arith.truncf %356 : vector<16x32xf32> to vector<16x32xbf16>
    %c1_124 = arith.constant 1 : index
    %c0_125 = arith.constant 0 : index
    %c0_126 = arith.constant 0 : index
    %358 = vector.load %arg7[%c1_124, %c0_125, %c0_126] : memref<2x32x32xbf16, #tpu.memory_space<vmem>>, vector<1x32x32xbf16>
    %359 = vector.shape_cast %358 : vector<1x32x32xbf16> to vector<32x32xbf16>
    %cst_127 = arith.constant dense<0.000000e+00> : vector<16x32xf32>
    %360 = tpu.matmul %357, %359, %cst_127 {dimension_numbers = #tpu.dot_dimension_numbers<[1], [0], [0], [1], [0, 0, 1, 1], [], []>} : vector<16x32xbf16>, vector<32x32xbf16>, vector<16x32xf32> -> vector<16x32xf32>
    %c16 = arith.constant 16 : index
    %c0_128 = arith.constant 0 : index
    %361 = vector.load %arg2[%c16, %c0_128] : memref<24x128xf32, #tpu.memory_space<vmem>>, vector<1x32xf32>
    %362 = vector.broadcast %361 : vector<1x32xf32> to vector<16x32xf32>
    %363 = arith.addf %360, %362 : vector<16x32xf32>
    %364 = arith.addf %278, %363 : vector<16x32xf32>
    %c17 = arith.constant 17 : index
    %c0_129 = arith.constant 0 : index
    %365 = vector.load %arg2[%c17, %c0_129] : memref<24x128xf32, #tpu.memory_space<vmem>>, vector<1x32xf32>
    %c18 = arith.constant 18 : index
    %c0_130 = arith.constant 0 : index
    %366 = vector.load %arg2[%c18, %c0_130] : memref<24x128xf32, #tpu.memory_space<vmem>>, vector<1x32xf32>
    %cst_131 = arith.constant dense<0.000000e+00> : vector<16xf32>
    %367 = vector.multi_reduction <add>, %364, %cst_131 [1] : vector<16x32xf32> to vector<16xf32>
    %368 = vector.shape_cast %367 : vector<16xf32> to vector<16x1xf32>
    %cst_132 = arith.constant 3.200000e+01 : f32
    %369 = vector.broadcast %cst_132 : f32 to vector<16x1xf32>
    %370 = arith.divf %368, %369 : vector<16x1xf32>
    %371 = vector.broadcast %370 : vector<16x1xf32> to vector<16x32xf32>
    %372 = arith.subf %364, %371 : vector<16x32xf32>
    %373 = arith.mulf %372, %372 : vector<16x32xf32>
    %cst_133 = arith.constant dense<0.000000e+00> : vector<16xf32>
    %374 = vector.multi_reduction <add>, %373, %cst_133 [1] : vector<16x32xf32> to vector<16xf32>
    %375 = vector.shape_cast %374 : vector<16xf32> to vector<16x1xf32>
    %cst_134 = arith.constant 3.200000e+01 : f32
    %376 = vector.broadcast %cst_134 : f32 to vector<16x1xf32>
    %377 = arith.divf %375, %376 : vector<16x1xf32>
    %378 = vector.broadcast %370 : vector<16x1xf32> to vector<16x32xf32>
    %379 = arith.subf %364, %378 : vector<16x32xf32>
    %cst_135 = arith.constant 9.99999974E-6 : f32
    %380 = vector.broadcast %cst_135 : f32 to vector<16x1xf32>
    %381 = arith.addf %377, %380 : vector<16x1xf32>
    %382 = math.rsqrt %381 : vector<16x1xf32>
    %383 = vector.broadcast %382 : vector<16x1xf32> to vector<16x32xf32>
    %384 = arith.mulf %379, %383 : vector<16x32xf32>
    %385 = vector.broadcast %365 : vector<1x32xf32> to vector<16x32xf32>
    %386 = arith.mulf %384, %385 : vector<16x32xf32>
    %387 = vector.broadcast %366 : vector<1x32xf32> to vector<16x32xf32>
    %388 = arith.addf %386, %387 : vector<16x32xf32>
    %389 = arith.truncf %388 : vector<16x32xf32> to vector<16x32xbf16>
    %c1_136 = arith.constant 1 : index
    %c0_137 = arith.constant 0 : index
    %c0_138 = arith.constant 0 : index
    %390 = vector.load %arg8[%c1_136, %c0_137, %c0_138] : memref<2x32x64xbf16, #tpu.memory_space<vmem>>, vector<1x32x64xbf16>
    %391 = vector.shape_cast %390 : vector<1x32x64xbf16> to vector<32x64xbf16>
    %cst_139 = arith.constant dense<0.000000e+00> : vector<16x64xf32>
    %392 = tpu.matmul %389, %391, %cst_139 {dimension_numbers = #tpu.dot_dimension_numbers<[1], [0], [0], [1], [0, 0, 1, 1], [], []>} : vector<16x32xbf16>, vector<32x64xbf16>, vector<16x64xf32> -> vector<16x64xf32>
    %c19 = arith.constant 19 : index
    %c0_140 = arith.constant 0 : index
    %393 = vector.load %arg2[%c19, %c0_140] : memref<24x128xf32, #tpu.memory_space<vmem>>, vector<1x64xf32>
    %394 = vector.broadcast %393 : vector<1x64xf32> to vector<16x64xf32>
    %395 = arith.addf %392, %394 : vector<16x64xf32>
    %396 = arith.mulf %395, %395 : vector<16x64xf32>
    %397 = arith.mulf %395, %396 : vector<16x64xf32>
    %cst_141 = arith.constant 4.471500e-02 : f32
    %398 = vector.broadcast %cst_141 : f32 to vector<16x64xf32>
    %399 = arith.mulf %398, %397 : vector<16x64xf32>
    %400 = arith.addf %395, %399 : vector<16x64xf32>
    %cst_142 = arith.constant 0.797884583 : f32
    %401 = vector.broadcast %cst_142 : f32 to vector<16x64xf32>
    %402 = arith.mulf %401, %400 : vector<16x64xf32>
    %403 = math.tanh %402 : vector<16x64xf32>
    %cst_143 = arith.constant 1.000000e+00 : f32
    %404 = vector.broadcast %cst_143 : f32 to vector<16x64xf32>
    %405 = arith.addf %404, %403 : vector<16x64xf32>
    %cst_144 = arith.constant 5.000000e-01 : f32
    %406 = vector.broadcast %cst_144 : f32 to vector<16x64xf32>
    %407 = arith.mulf %406, %405 : vector<16x64xf32>
    %408 = arith.mulf %395, %407 : vector<16x64xf32>
    %409 = arith.truncf %408 : vector<16x64xf32> to vector<16x64xbf16>
    %c1_145 = arith.constant 1 : index
    %c0_146 = arith.constant 0 : index
    %c0_147 = arith.constant 0 : index
    %410 = vector.load %arg9[%c1_145, %c0_146, %c0_147] : memref<2x64x32xbf16, #tpu.memory_space<vmem>>, vector<1x64x32xbf16>
    %411 = vector.shape_cast %410 : vector<1x64x32xbf16> to vector<64x32xbf16>
    %cst_148 = arith.constant dense<0.000000e+00> : vector<16x32xf32>
    %412 = tpu.matmul %409, %411, %cst_148 {dimension_numbers = #tpu.dot_dimension_numbers<[1], [0], [0], [1], [0, 0, 1, 1], [], []>} : vector<16x64xbf16>, vector<64x32xbf16>, vector<16x32xf32> -> vector<16x32xf32>
    %c20 = arith.constant 20 : index
    %c0_149 = arith.constant 0 : index
    %413 = vector.load %arg2[%c20, %c0_149] : memref<24x128xf32, #tpu.memory_space<vmem>>, vector<1x32xf32>
    %414 = vector.broadcast %413 : vector<1x32xf32> to vector<16x32xf32>
    %415 = arith.addf %412, %414 : vector<16x32xf32>
    %416 = arith.addf %388, %415 : vector<16x32xf32>
    %c21 = arith.constant 21 : index
    %c0_150 = arith.constant 0 : index
    %417 = vector.load %arg2[%c21, %c0_150] : memref<24x128xf32, #tpu.memory_space<vmem>>, vector<1x32xf32>
    %c22 = arith.constant 22 : index
    %c0_151 = arith.constant 0 : index
    %418 = vector.load %arg2[%c22, %c0_151] : memref<24x128xf32, #tpu.memory_space<vmem>>, vector<1x32xf32>
    %cst_152 = arith.constant dense<0.000000e+00> : vector<16xf32>
    %419 = vector.multi_reduction <add>, %416, %cst_152 [1] : vector<16x32xf32> to vector<16xf32>
    %420 = vector.shape_cast %419 : vector<16xf32> to vector<16x1xf32>
    %cst_153 = arith.constant 3.200000e+01 : f32
    %421 = vector.broadcast %cst_153 : f32 to vector<16x1xf32>
    %422 = arith.divf %420, %421 : vector<16x1xf32>
    %423 = vector.broadcast %422 : vector<16x1xf32> to vector<16x32xf32>
    %424 = arith.subf %416, %423 : vector<16x32xf32>
    %425 = arith.mulf %424, %424 : vector<16x32xf32>
    %cst_154 = arith.constant dense<0.000000e+00> : vector<16xf32>
    %426 = vector.multi_reduction <add>, %425, %cst_154 [1] : vector<16x32xf32> to vector<16xf32>
    %427 = vector.shape_cast %426 : vector<16xf32> to vector<16x1xf32>
    %cst_155 = arith.constant 3.200000e+01 : f32
    %428 = vector.broadcast %cst_155 : f32 to vector<16x1xf32>
    %429 = arith.divf %427, %428 : vector<16x1xf32>
    %430 = vector.broadcast %422 : vector<16x1xf32> to vector<16x32xf32>
    %431 = arith.subf %416, %430 : vector<16x32xf32>
    %cst_156 = arith.constant 9.99999974E-6 : f32
    %432 = vector.broadcast %cst_156 : f32 to vector<16x1xf32>
    %433 = arith.addf %429, %432 : vector<16x1xf32>
    %434 = math.rsqrt %433 : vector<16x1xf32>
    %435 = vector.broadcast %434 : vector<16x1xf32> to vector<16x32xf32>
    %436 = arith.mulf %431, %435 : vector<16x32xf32>
    %437 = vector.broadcast %417 : vector<1x32xf32> to vector<16x32xf32>
    %438 = arith.mulf %436, %437 : vector<16x32xf32>
    %439 = vector.broadcast %418 : vector<1x32xf32> to vector<16x32xf32>
    %440 = arith.addf %438, %439 : vector<16x32xf32>
    %cst_157 = arith.constant dense<0.000000e+00> : vector<32xf32>
    %441 = vector.multi_reduction <add>, %440, %cst_157 [0] : vector<16x32xf32> to vector<32xf32>
    %cst_158 = arith.constant 1.600000e+01 : f32
    %442 = vector.broadcast %cst_158 : f32 to vector<32xf32>
    %443 = arith.divf %441, %442 : vector<32xf32>
    %444 = vector.shape_cast %443 : vector<32xf32> to vector<1x1x32xf32>
    %c0_159 = arith.constant 0 : index
    %c0_160 = arith.constant 0 : index
    %c0_161 = arith.constant 0 : index
    %445 = vector.load %arg10[%c0_159, %c0_160, %c0_161] : memref<1x1x32xf32, #tpu.memory_space<vmem>>, vector<1x1x32xf32>
    tpu.vector_store %arg10[%c0_159, %c0_160, %c0_161], %444 {strides = array<i32>} : memref<1x1x32xf32, #tpu.memory_space<vmem>>, vector<1x1x32xf32>,
    return
  }
  func.func @transform_0(%arg0: i32) -> (i32, i32, i32) {
    %c0_i32 = arith.constant 0 : i32
    %c0_i32_0 = arith.constant 0 : i32
    %c0_i32_1 = arith.constant 0 : i32
    return %arg0, %c0_i32, %c0_i32_0 : i32, i32, i32
  }
  func.func @transform_1(%arg0: i32) -> (i32, i32) {
    %c0_i32 = arith.constant 0 : i32
    %c0_i32_0 = arith.constant 0 : i32
    %c0_i32_1 = arith.constant 0 : i32
    return %c0_i32, %c0_i32_0 : i32, i32
  }
  func.func @transform_2(%arg0: i32) -> (i32, i32) {
    %c0_i32 = arith.constant 0 : i32
    %c0_i32_0 = arith.constant 0 : i32
    %c0_i32_1 = arith.constant 0 : i32
    return %c0_i32, %c0_i32_0 : i32, i32
  }
  func.func @transform_3(%arg0: i32) -> (i32, i32) {
    %c0_i32 = arith.constant 0 : i32
    %c0_i32_0 = arith.constant 0 : i32
    %c0_i32_1 = arith.constant 0 : i32
    return %c0_i32, %c0_i32_0 : i32, i32
  }
  func.func @transform_4(%arg0: i32) -> (i32, i32) {
    %c0_i32 = arith.constant 0 : i32
    %c0_i32_0 = arith.constant 0 : i32
    %c0_i32_1 = arith.constant 0 : i32
    return %c0_i32, %c0_i32_0 : i32, i32
  }
  func.func @transform_5(%arg0: i32) -> (i32, i32, i32) {
    %c0_i32 = arith.constant 0 : i32
    %c0_i32_0 = arith.constant 0 : i32
    %c0_i32_1 = arith.constant 0 : i32
    %c0_i32_2 = arith.constant 0 : i32
    return %c0_i32, %c0_i32_0, %c0_i32_1 : i32, i32, i32
  }
  func.func @transform_6(%arg0: i32) -> (i32, i32, i32) {
    %c0_i32 = arith.constant 0 : i32
    %c0_i32_0 = arith.constant 0 : i32
    %c0_i32_1 = arith.constant 0 : i32
    %c0_i32_2 = arith.constant 0 : i32
    return %c0_i32, %c0_i32_0, %c0_i32_1 : i32, i32, i32
  }
  func.func @transform_7(%arg0: i32) -> (i32, i32, i32) {
    %c0_i32 = arith.constant 0 : i32
    %c0_i32_0 = arith.constant 0 : i32
    %c0_i32_1 = arith.constant 0 : i32
    %c0_i32_2 = arith.constant 0 : i32
    return %c0_i32, %c0_i32_0, %c0_i32_1 : i32, i32, i32
  }
  func.func @transform_8(%arg0: i32) -> (i32, i32, i32) {
    %c0_i32 = arith.constant 0 : i32
    %c0_i32_0 = arith.constant 0 : i32
    %c0_i32_1 = arith.constant 0 : i32
    %c0_i32_2 = arith.constant 0 : i32
    return %c0_i32, %c0_i32_0, %c0_i32_1 : i32, i32, i32
  }
  func.func @transform_9(%arg0: i32) -> (i32, i32, i32) {
    %c0_i32 = arith.constant 0 : i32
    %c0_i32_0 = arith.constant 0 : i32
    %c0_i32_1 = arith.constant 0 : i32
    return %arg0, %c0_i32, %c0_i32_0 : i32, i32, i32
  }
}

</mosaic_0001>

<bundles_post_ra>
// kernel: hubert_encoder_forward.1
= control target key start
LH: loop header
LB: loop body
LE: loop exit
PB: predicated region body
PF: predicated region fallthrough
CT: control target
= control target key end

     0   :  { %14 = vsyncpa [#allocation4], 0  ;;  %s4038_s0 = inlined_call_operand.vmem [shape: f32[2,33,10], index: 0, kind: input, shape index: {}]   ;;  %s4039_s1 = inlined_call_operand.vmem [shape: f32[24,128], index: 1, kind: input, shape index: {}]   ;;  %s4040_s2 = inlined_call_operand.vmem [shape: bf16[10,32], index: 2, kind: input, shape index: {}]   ;;  %s4041_s3 = inlined_call_operand.vmem [shape: bf16[96,32], index: 3, kind: input, shape index: {}]   ;;  %s4042_s4 = inlined_call_operand.vmem [shape: bf16[32,32], index: 4, kind: input, shape index: {}]   ;;  %s4043_s5 = inlined_call_operand.vmem [shape: bf16[2,32,96], index: 5, kind: input, shape index: {}]   ;;  %s4044_s6 = inlined_call_operand.vmem [shape: bf16[2,32,32], index: 6, kind: input, shape index: {}]   ;;  %s4045_s7 = inlined_call_operand.vmem [shape: bf16[2,32,64], index: 7, kind: input, shape index: {}]   ;;  %s4046_s8 = inlined_call_operand.vmem [shape: bf16[2,64,32], index: 8, kind: input, shape index: {}]   ;;  %s4047_s9 = inlined_call_operand.hbm [shape: f32[2,1,32], index: 9, kind: output, shape index: {}]  }
   0x1   :  { %16 = vsyncpa [#allocation4 + $0x1], 0  ;;  %s3467_s30 = smov 0   ;;  %s3469_s10 = smov 0  }
   0x2   :  { %s3471_s11 = smov 0   ;;  %s3473_s12 = smov 0  }
   0x3 LB: > { %s3488_s13 = sadd.s32 4294967295, %s3397_s12   ;;  %s2708_s14 = sadd.s32 4294967294, %s3397_s12   ;;  %s3397_s12 = sphi %s3473_s12, %s4071_s12   ;;  %s3393_s11 = sphi %s3471_s11, %s4070_s11   ;;  %s3389_s10 = sphi %s3469_s10, %s4069_s10   ;;  %s3385_s30 = sphi %s3467_s30, %s4068_s30  }
   0x4   : > { %s3492_s15 = sadd.s32 1, %s3397_s12   ;;  %s223_s16 = sadd.s32 1, %s3393_s11 }
   0x5   : > { %s220_s17 = ssub.s32 %s3397_s12, %s3492_s15  ;;  %p233_p0 = scmp.ne.s32.totalorder %s3393_s11, %s3389_s10 }
   0x6   : > { %p221_p1 = scmp.eq.s32.totalorder %s220_s17, 0  ;;  %p234_p2 = scmp.eq.s32.totalorder %s3488_s13, 1 }
   0x7   : > { %p239_p3 = scmp.ne.s32.totalorder %s3389_s10, %s3385_s30  ;;  %p240_p4 = scmp.eq.s32.totalorder %s2708_s14, 1 }
   0x8   : > { %s3503_s18 = scalar_select %p221_p1, %s3393_s11, %s223_s16  }
   0x9   : > { %p3505_p5 = por %p234_p2, %p233_p0  ;;  %p3509_p6 = por %p240_p4, %p239_p3 }
   0xa   : > { %p2711_p7 = scmp.ge.s32.totalorder %s3397_s12, 1  ;;  %p290_p8 = scmp.lt.s32.totalorder %s3397_s12, 3 }
   0xc   : > { %p291_p9 = pnand %p2711_p7, %p290_p8 }
   0xd   : > { %vm356_vm0 = vcmask (!%p291_p9), 1044480   ;;  %v3399_v0 = vmov (!%p291_p9), 0.0   ;;  %v3194_v1 = vld [vmem:[%s4040_s2] sm:$0x1f] (!%p291_p9)   ;;  %p325_p10 = scmp.lt.s32.totalorder (!%p291_p9), %s3488_s13, 1  ;;  %vm3400_vm1 = vmmov (!%p291_p9), 0  }
   0xe   : > { %294 = sbr.rel (%p291_p9) target bundleno = 6782 (0x1a7e), region = 56  ;;  %2891 = vmatprep.subr.bf16.mxu0 (!%p291_p9), %v3399_v0  ;;  %2921 = vmatprep.subr.bf16.mxu1 (!%p291_p9), %v3399_v0  ;;  %v358_v2 = vsel (!%p291_p9), %vm356_vm0, %v3194_v1, 0  ;;  %vm346_vm2 = vcmask (!%p291_p9), 80896   ;;  %v3195_v11 = vld [vmem:[%s4041_s3] sm:$0xff] (!%p291_p9)   ;;  %v3196_v12 = vld [vmem:[%s4041_s3 + $0x8] sm:$0xff] (!%p291_p9)   ;;  %vm416_vm3 = vcmask (!%p291_p9), 261120  }
   0xf   : > { %2893 = vmatprep.mubr.msk.bf16.mxu0 (!%p291_p9), %vm3400_vm1, %v3399_v0  ;;  %2925 = vmatprep.mubr.msk.bf16.mxu1 (!%p291_p9), %vm3400_vm1, %v3399_v0  ;;  %v3197_v16 = vld [vmem:[%s4041_s3 + $0x10] sm:$0xff] (!%p291_p9)   ;;  %v3198_v21 = vld [vmem:[%s4041_s3 + $0x18] sm:$0xff] (!%p291_p9)   ;;  %vm424_vm4 = vcmask (!%p291_p9), 253952   ;;  %s3401_s17 = smov (!%p291_p9), 32   ;;  %s4050_s21 = smov (!%p291_p9), 64   ;;  %vm567_vm5 = vcmask (!%p291_p9), 523264  }
  0x10   : > { %2892 = vmatpush3.bf16.msra.mxu0 (!%p291_p9), %v358_v2  ;;  %vm619_vm6 = vcmask (!%p291_p9), 785408   ;;  %s3403_s16 = smov (!%p291_p9), 88   ;;  %s3405_s22 = smov (!%p291_p9), 104   ;;  %vm899_vm7 = vcmask (!%p291_p9), 64512   ;;  %vm947_vm8 = vcmask (!%p291_p9), 130048   ;;  %vm1409_vm9 = vcmask (!%p291_p9), 195584  }
  0x11   : > { %2905 = vmatprep.subr.bf16.mxu0 (!%p291_p9), %v3399_v0  ;;  %s3408_s25 = smov (!%p291_p9), 112   ;;  %s4055_s26 = smov (!%p291_p9), 72  }
  0x12   : > { %s4049_s28 = smov (!%p291_p9), 48   ;;  %s4048_s29 = smov (!%p291_p9), 40  }
  0x13   : > { %s4052_s14 = smov (!%p291_p9), 24  }
  0x15   : > { %s326_s23 = scalar_select %p325_p10, %s3488_s13, 1 }
  0x17   : > { %s3097_s24 = smul.u32 40, %s326_s23  ;;  %s3406_s23 = smov 120  }
  0x19   : > { %s329_s27 = scalar_lea.vmem %s4038_s0, %s3097_s24  ;;  %s4056_s24 = smov 80  }
  0x1a   : > { %v331_v3 = vld [vmem:[%s329_s27] sm:$0xff]  ;;  %v332_v4 = vld [vmem:[%s329_s27 + $0x8] sm:$0xff]  ;;  %v333_v6 = vld [vmem:[%s329_s27 + $0x10] sm:$0xff] }
  0x1b   : > { %v336_v5 = vpack.c.bf16 %v332_v4, %v331_v3  ;;  %v334_v7 = vld [vmem:[%s329_s27 + $0x18] sm:$0xff]  ;;  %v335_v9 = vld [vmem:[%s329_s27 + $0x20] sm:$0x1]  ;;  %s4051_s27 = smov 56  }
  0x1c   : > { %v337_v8 = vpack.c.bf16 %v334_v7, %v333_v6  ;;  %v338_v10 = vpack.c.bf16 %v335_v9, %v335_v9 }
  0x1d   : > { %2894 = vmatmul.mubr.msk.bf16.vlgmr.msra.gmra.mrb[0].mxu0 %vm346_vm2, %v336_v5 }
  0x1e   : > { %2897 = vmatprep.mubr.msk.bf16.mxu0 %vm3400_vm1, %v3399_v0  ;;  %2906 = vmatpush3.bf16.msra.mxu0 %v3195_v11 }
  0x1f   : > { %2907 = vmatprep.subr.bf16.mxu0 %v3399_v0 }
  0x22   : > { %2908 = vmatpush3.bf16.msra.mxu0 %v3196_v12 }
  0x23   : > { %2909 = vmatprep.subr.bf16.mxu0 %v3399_v0 }
  0x25   : > { %2898 = vmatmul.mubr.msk.bf16.gmra.mrb[4].mxu0 %vm346_vm2, %v337_v8  ;;  %v2717_v8 = vld [vmem:[%s4039_s1] ss:$0 sm:$0xff] }
  0x26   : > { %2901 = vmatprep.mubr.msk.bf16.mxu0 %vm3400_vm1, %v3399_v0  ;;  %2910 = vmatpush3.bf16.msra.mxu0 %v3197_v16 }
  0x27   : > { %2911 = vmatprep.subr.bf16.mxu0 %v3399_v0 }
  0x2a   : > { %2912 = vmatpush3.bf16.msra.mxu0 %v3198_v21 }
  0x2b   : > { %2913 = vmatprep.subr.bf16.mxu0 %v3399_v0 }
  0x2d   : > { %2902 = vmatmul.mubr.msk.bf16.gmra.mrb[8].mxu0 %vm346_vm2, %v338_v10 }
  0x2e   : > { %2917 = vmatprep.mubr.msk.bf16.mxu0 %vm3400_vm1, %v3399_v0 }
  0xf0   : > { %v394_v13 = vpop.f32.mrb[0].mxu0 }
  0xf1   : > { %v2895_v14 = vpop.f32.mrb[1].mxu0  ;;  %v417_v17 = vsel %vm416_vm3, %v394_v13, 0.0 }
  0xf2   : > { %v397_v15 = vpop.f32.mrb[2].mxu0  ;;  %v2718_v14 = vld [vmem:[%s4039_s1 + $0x1] ss:$0 sm:$0xff] }
  0xf3   : > { %v418_v18 = vsel %vm416_vm3, %v397_v15, 0.0  ;;  %v2896_v19 = vpop.f32.mrb[3].mxu0 }
  0xf4   : > { %v419_v20 = vadd.f32 %v418_v18, %v417_v17 }
  0xf8   : > { %v402_v22 = vpop.f32.mrb[4].mxu0 }
  0xf9   : > { %v420_v23 = vsel %vm416_vm3, %v402_v22, 0.0  ;;  %v2899_v24 = vpop.f32.mrb[5].mxu0 }
  0xfa   : > { %v421_v25 = vadd.f32 %v420_v23, %v419_v20  ;;  %v405_v26 = vpop.f32.mrb[6].mxu0 }
  0xfb   : > { %v422_v27 = vsel %vm416_vm3, %v405_v26, 0.0  ;;  %v2900_v28 = vpop.f32.mrb[7].mxu0 }
  0xfc   : > { %v423_v29 = vadd.f32 %v422_v27, %v421_v25 }
 0x100   : > { %v410_v30 = vpop.f32.mrb[8].mxu0 }
 0x101   : > { %v425_v31 = vsel %vm424_vm4, %v410_v30, 0.0  ;;  %v2903_v32 = vpop.f32.mrb[9].mxu0 }
 0x102   : > { %v426_v33 = vadd.f32 %v425_v31, %v423_v29  ;;  %v413_v34 = vpop.f32.mrb[10].mxu0 }
 0x103   : > { %v2904_v35 = vpop.f32.mrb[11].mxu0 }
 0x104   : > { %v427_v36 = vrot.slane %v426_v33, 4 }
 0x106   : > { %v428_v37 = vadd.f32 %v427_v36, %v426_v33 }
 0x108   : > { %v429_v38 = vrot.slane %v428_v37, 2 }
 0x10a   : > { %v430_v39 = vadd.f32 %v429_v38, %v428_v37 }
 0x10c   : > { %v431_v40 = vrot.slane %v430_v39, 1 }
 0x10e   : > { %v432_v41 = vadd.f32 %v431_v40, %v430_v39 }
 0x110   : > { %v434_v42 = vmul.f32 0.030303031, %v432_v41 }
 0x112   : > { %v435_v43 = vsub.f32 %v394_v13, %v434_v42  ;;  %v436_v44 = vsub.f32 %v397_v15, %v434_v42  ;;  %v437_v45 = vsub.f32 %v402_v22, %v434_v42  ;;  %v438_v46 = vsub.f32 %v405_v26, %v434_v42 }
 0x113   : > { %v439_v47 = vsub.f32 %v410_v30, %v434_v42 }
 0x114   : > { %v440_v48 = vmul.f32 %v435_v43, %v435_v43  ;;  %v441_v49 = vmul.f32 %v436_v44, %v436_v44  ;;  %v442_v50 = vmul.f32 %v437_v45, %v437_v45  ;;  %v443_v51 = vmul.f32 %v438_v46, %v438_v46 }
 0x115   : > { %v444_v55 = vmul.f32 %v439_v47, %v439_v47 }
 0x116   : > { %v445_v52 = vsel %vm416_vm3, %v440_v48, 0.0  ;;  %v446_v53 = vsel %vm416_vm3, %v441_v49, 0.0  ;;  %v448_v56 = vsel %vm416_vm3, %v442_v50, 0.0  ;;  %v450_v58 = vsel %vm416_vm3, %v443_v51, 0.0 }
 0x117   : > { %v447_v54 = vadd.f32 %v446_v53, %v445_v52  ;;  %v452_v60 = vsel %vm424_vm4, %v444_v55, 0.0 }
 0x119   : > { %v449_v57 = vadd.f32 %v448_v56, %v447_v54 }
 0x11b   : > { %v451_v59 = vadd.f32 %v450_v58, %v449_v57 }
 0x11d   : > { %v453_v61 = vadd.f32 %v452_v60, %v451_v59 }
 0x11f   : > { %v454_v62 = vrot.slane %v453_v61, 4 }
 0x121   : > { %v455_v63 = vadd.f32 %v454_v62, %v453_v61 }
 0x123   : > { %v456_v1 = vrot.slane %v455_v63, 2 }
 0x125   : > { %v457_v2 = vadd.f32 %v456_v1, %v455_v63 }
 0x127   : > { %v458_v3 = vrot.slane %v457_v2, 1 }
 0x129   : > { %v459_v4 = vadd.f32 %v458_v3, %v457_v2 }
 0x12b   : > { %v460_v5 = vmul.f32 0.030303031, %v459_v4 }
 0x12d   : > { %v461_v6 = vadd.f32 1e-05, %v460_v5 }
 0x12f   : > { %3223 = vrsqrt.f32 %v461_v6  ;;  %v3199_v6 = vld [vmem:[%s4041_s3 + $0x20] sm:$0xff]  }
 0x130   : > { %2914 = vmatpush3.bf16.msra.mxu0 %v3199_v6 }
 0x131   : > { %2915 = vmatprep.subr.bf16.mxu0 %v3399_v0 }
 0x139   : > { %v3224_v7 = vpop.eup %3223 }
 0x13a   : > { %v463_v9 = vmul.f32 %v3224_v7, %v435_v43  ;;  %v464_v10 = vmul.f32 %v3224_v7, %v436_v44  ;;  %v465_v11 = vmul.f32 %v3224_v7, %v437_v45  ;;  %v466_v12 = vmul.f32 %v3224_v7, %v438_v46 }
 0x13b   : > { %v467_v13 = vmul.f32 %v3224_v7, %v439_v47 }
 0x13c   : > { %v473_v15 = vmul.f32 %v2717_v8, %v463_v9  ;;  %v474_v16 = vmul.f32 %v2717_v8, %v464_v10  ;;  %v475_v17 = vmul.f32 %v2717_v8, %v465_v11  ;;  %v476_v18 = vmul.f32 %v2717_v8, %v466_v12 }
 0x13d   : > { %v477_v19 = vmul.f32 %v2717_v8, %v467_v13  ;;  %v3200_v8 = vld [vmem:[%s4041_s3 + $0x28] sm:$0xff]  }
 0x13e   : > { %v483_v20 = vadd.f32 %v2718_v14, %v473_v15  ;;  %v484_v21 = vadd.f32 %v2718_v14, %v474_v16  ;;  %v485_v22 = vadd.f32 %v2718_v14, %v475_v17  ;;  %v486_v23 = vadd.f32 %v2718_v14, %v476_v18  ;;  %2916 = vmatpush3.bf16.msra.mxu0 %v3200_v8 }
 0x13f   : > { %v487_v24 = vadd.f32 %v2718_v14, %v477_v19  ;;  %2937 = vmatprep.subr.bf16.mxu0 %v3399_v0 }
 0x140   : > { %v488_v25 = vmul.f32 %v483_v20, %v483_v20  ;;  %v489_v26 = vmul.f32 %v484_v21, %v484_v21  ;;  %v490_v27 = vmul.f32 %v485_v22, %v485_v22  ;;  %v491_v28 = vmul.f32 %v486_v23, %v486_v23 }
 0x141   : > { %v492_v29 = vmul.f32 %v487_v24, %v487_v24 }
 0x142   : > { %v493_v30 = vmul.f32 %v488_v25, %v483_v20  ;;  %v494_v31 = vmul.f32 %v489_v26, %v484_v21  ;;  %v495_v32 = vmul.f32 %v490_v27, %v485_v22  ;;  %v496_v33 = vmul.f32 %v491_v28, %v486_v23 }
 0x143   : > { %v497_v34 = vmul.f32 %v492_v29, %v487_v24 }
 0x144   : > { %v498_v35 = vmul.f32 0.044715, %v493_v30  ;;  %v499_v36 = vmul.f32 0.044715, %v494_v31  ;;  %v500_v37 = vmul.f32 0.044715, %v495_v32 }
 0x145   : > { %v501_v38 = vmul.f32 0.044715, %v496_v33  ;;  %v502_v39 = vmul.f32 0.044715, %v497_v34 }
 0x146   : > { %v503_v40 = vadd.f32 %v498_v35, %v483_v20  ;;  %v504_v41 = vadd.f32 %v499_v36, %v484_v21  ;;  %v505_v42 = vadd.f32 %v500_v37, %v485_v22 }
 0x147   : > { %v506_v43 = vadd.f32 %v501_v38, %v486_v23  ;;  %v507_v44 = vadd.f32 %v502_v39, %v487_v24 }
 0x148   : > { %v508_v45 = vmul.f32 0.7978846, %v503_v40  ;;  %v509_v46 = vmul.f32 0.7978846, %v504_v41  ;;  %v510_v47 = vmul.f32 0.7978846, %v505_v42 }
 0x149   : > { %v511_v48 = vmul.f32 0.7978846, %v506_v43  ;;  %v512_v49 = vmul.f32 0.7978846, %v507_v44 }
 0x14a   : > { %3225 = vtanh.f32 %v508_v45 }
 0x14b   : > { %3227 = vtanh.f32 %v509_v46 }
 0x14c   : > { %3229 = vtanh.f32 %v510_v47 }
 0x14d   : > { %3231 = vtanh.f32 %v511_v48 }
 0x14e   : > { %3233 = vtanh.f32 %v512_v49 }
 0x154   : > { %v3226_v50 = vpop.eup %3225 }
 0x155   : > { %v3228_v51 = vpop.eup %3227  ;;  %v518_v52 = vadd.f32 1.0, %v3226_v50 }
 0x156   : > { %v3230_v53 = vpop.eup %3229  ;;  %v519_v54 = vadd.f32 1.0, %v3228_v51 }
 0x157   : > { %v3232_v55 = vpop.eup %3231  ;;  %v520_v56 = vadd.f32 1.0, %v3230_v53  ;;  %v523_v57 = vmul.f32 0.5, %v518_v52 }
 0x158   : > { %v3234_v58 = vpop.eup %3233  ;;  %v521_v59 = vadd.f32 1.0, %v3232_v55  ;;  %v524_v60 = vmul.f32 0.5, %v519_v54 }
 0x159   : > { %v522_v61 = vadd.f32 1.0, %v3234_v58  ;;  %v525_v62 = vmul.f32 0.5, %v520_v56  ;;  %v528_v63 = vmul.f32 %v523_v57, %v483_v20 }
 0x15a   : > { %v526_v1 = vmul.f32 0.5, %v521_v59  ;;  %v529_v2 = vmul.f32 %v524_v60, %v484_v21 }
 0x15b   : > { %v527_v3 = vmul.f32 0.5, %v522_v61  ;;  %v530_v4 = vmul.f32 %v525_v62, %v485_v22  ;;  %533 = vst.msk [vmem:[#allocation2] sm:$0xff] %vm416_vm3, %v528_v63  ;;  %v3201_v62 = vld [vmem:[%s4042_s4] sm:$0xff]   ;;  %v3202_v63 = vld [vmem:[%s4042_s4 + $0x8] sm:$0xff]  }
 0x15c   : > { %v531_v5 = vmul.f32 %v526_v1, %v486_v23  ;;  %534 = vst.msk [vmem:[#allocation2 + $0x8] sm:$0xff] %vm416_vm3, %v529_v2  ;;  %2922 = vmatpush3.bf16.msra.mxu1 %v3201_v62 }
 0x15d   : > { %v532_v7 = vmul.f32 %v527_v3, %v487_v24  ;;  %535 = vst.msk [vmem:[#allocation2 + $0x10] sm:$0xff] %vm416_vm3, %v530_v4  ;;  %2923 = vmatprep.subr.bf16.mxu1 %v3399_v0 }
 0x15e   : > { %536 = vst.msk [vmem:[#allocation2 + $0x18] sm:$0xff] %vm416_vm3, %v531_v5 }
 0x15f   : > { %537 = vst.msk [vmem:[#allocation2 + $0x20] sm:$0x1] %vm424_vm4, %v532_v7 }
 0x160   : > { %2924 = vmatpush3.bf16.msra.mxu1 %v3202_v63 }
 0x161   : > { %2929 = vmatprep.subr.bf16.mxu1 %v3399_v0 }
 0x163   : > { %v542_v9 = vld [vmem:[#allocation2 + $0x1] ss:$2 sm:$0xff]  ;;  %v538_v20 = vld [vmem:[#allocation2] ss:$2 sm:$0xff] }
 0x164   : > { %v546_v12 = vld [vmem:[#allocation2 + $0x2] ss:$2 sm:$0xff] }
 0x165   : > { %v544_v10 = vld [vmem:[#allocation2 + $0x11] ss:$2 sm:$0xff]  ;;  %v540_v19 = vld [vmem:[#allocation2 + $0x10] ss:$2 sm:$0xff] }
 0x166   : > { %v3154_v11 = vpack.i.bf16 %v544_v10, %v542_v9  ;;  %v548_v13 = vld [vmem:[#allocation2 + $0x12] ss:$2 sm:$0xff]  ;;  %v2726_v9 = vld [vmem:[%s4039_s1 + $0x2] ss:$0 sm:$0xff] }
 0x167   : > { %v3159_v14 = vpack.i.bf16 %v548_v13, %v546_v12  ;;  %v2727_v13 = vld [vmem:[%s4039_s1 + $0x3] ss:$0 sm:$0xff] }
 0x168   : > { %3155 = vrot.lane.b32.xlu0 %v3154_v11, %s3401_s17  ;;  %s3404_s17 = smov 96  }
 0x16c   : > { %3160 = vrot.lane.b32.xlu0 %v3159_v14, %s4050_s21 }
 0x1da   : > { %v3156_v15 = vpop.permute.xlu0 %3155 }
 0x1db   : > { %v3158_v16 = vunpack.i.h.bf16 %v3156_v15  ;;  %v3157_v17 = vunpack.i.l.bf16 %v3156_v15 }
 0x1dd   : > { %v566_v23 = vsel %vm416_vm3, %v540_v19, %v3158_v16  ;;  %v565_v24 = vsel %vm416_vm3, %v538_v20, %v3157_v17 }
 0x1de   : > { %v3161_v18 = vpop.permute.xlu0 %3160 }
 0x1df   : > { %v3163_v21 = vunpack.i.h.bf16 %v3161_v18  ;;  %v3162_v22 = vunpack.i.l.bf16 %v3161_v18  ;;  %v2728_v18 = vld [vmem:[%s4039_s1 + $0x4] ss:$0 sm:$0xff] }
 0x1e1   : > { %v568_v25 = vsel %vm567_vm5, %v565_v24, %v3162_v22  ;;  %v569_v26 = vsel %vm567_vm5, %v566_v23, %v3163_v21 }
 0x1e2   : > { %v570_v27 = vpack.c.bf16 %v569_v26, %v568_v25 }
 0x1e4   : > { %2918 = vmatmul.mubr.msk.bf16.vlgmr.msra.gmra.mrb[12].mxu0 %vm619_vm6, %v570_v27 }
 0x1e5   : > { %2939 = vmatprep.mubr.msk.bf16.mxu0 %vm3400_vm1, %v3399_v0 }
 0x2b7   : > { %v657_v28 = vpop.f32.mrb[12].mxu0 }
 0x2b8   : > { %v664_v29 = vmul.f32 %v657_v28, %v657_v28  ;;  %v2919_v30 = vpop.f32.mrb[13].mxu0 }
 0x2b9   : > { %v660_v31 = vpop.f32.mrb[14].mxu0 }
 0x2ba   : > { %v666_v32 = vmul.f32 %v664_v29, %v657_v28  ;;  %v665_v33 = vmul.f32 %v660_v31, %v660_v31  ;;  %v2920_v34 = vpop.f32.mrb[15].mxu0 }
 0x2bc   : > { %v668_v35 = vmul.f32 0.044715, %v666_v32  ;;  %v667_v36 = vmul.f32 %v665_v33, %v660_v31 }
 0x2be   : > { %v670_v37 = vadd.f32 %v668_v35, %v657_v28  ;;  %v669_v38 = vmul.f32 0.044715, %v667_v36 }
 0x2c0   : > { %v672_v39 = vmul.f32 0.7978846, %v670_v37  ;;  %v671_v40 = vadd.f32 %v669_v38, %v660_v31  ;;  %v3203_v37 = vld [vmem:[%s4043_s5] sm:$0xff]   ;;  %v3204_v38 = vld [vmem:[%s4043_s5 + $0x8] sm:$0xff]  }
 0x2c2   : > { %3235 = vtanh.f32 %v672_v39  ;;  %v673_v41 = vmul.f32 0.7978846, %v671_v40 }
 0x2c4   : > { %3237 = vtanh.f32 %v673_v41 }
 0x2cc   : > { %v3236_v42 = vpop.eup %3235 }
 0x2cd   : > { %v676_v43 = vadd.f32 1.0, %v3236_v42 }
 0x2ce   : > { %v3238_v44 = vpop.eup %3237 }
 0x2cf   : > { %v678_v45 = vmul.f32 0.5, %v676_v43  ;;  %v677_v46 = vadd.f32 1.0, %v3238_v44 }
 0x2d1   : > { %v680_v47 = vmul.f32 %v678_v45, %v657_v28  ;;  %v679_v48 = vmul.f32 0.5, %v677_v46 }
 0x2d3   : > { %v684_v49 = vsel %vm416_vm3, %v680_v47, 0.0  ;;  %v681_v50 = vmul.f32 %v679_v48, %v660_v31 }
 0x2d4   : > { %685 = vadd.xlane.f32.xlu1 %v684_v49 }
 0x2d5   : > { %v687_v51 = vsel %vm416_vm3, %v681_v50, 0.0 }
 0x2d8   : > { %688 = vadd.xlane.f32.xlu1 %v687_v51  ;;  %v2733_v51 = vld [vmem:[%s4039_s1 + $0x6] ss:$0 sm:$0xff] }
 0x361   : > { %v686_v52 = vpop.xlane.xlu1 %685 }
 0x362   : > { %v691_v53 = vmul.f32 0.03125, %v686_v52 }
 0x364   : > { %v693_v54 = vsub.f32 %v680_v47, %v691_v53  ;;  %v2732_v47 = vld [vmem:[%s4039_s1 + $0x5] ss:$0 sm:$0xff] }
 0x365   : > { %v689_v55 = vpop.xlane.xlu1 %688 }
 0x366   : > { %v692_v56 = vmul.f32 0.03125, %v689_v55  ;;  %v695_v57 = vmul.f32 %v693_v54, %v693_v54 }
 0x368   : > { %v694_v58 = vsub.f32 %v681_v50, %v692_v56  ;;  %v697_v59 = vsel %vm416_vm3, %v695_v57, 0.0  ;;  %v2734_v56 = vld [vmem:[%s4039_s1 + $0x7] ss:$0 sm:$0xff] }
 0x369   : > { %698 = vadd.xlane.f32.xlu0 %v697_v59 }
 0x36a   : > { %v696_v60 = vmul.f32 %v694_v58, %v694_v58 }
 0x36c   : > { %v700_v61 = vsel %vm416_vm3, %v696_v60, 0.0 }
 0x36d   : > { %701 = vadd.xlane.f32.xlu1 %v700_v61 }
 0x3f6   : > { %v699_v1 = vpop.xlane.xlu0 %698 }
 0x3f7   : > { %v703_v2 = vmul.f32 0.03125, %v699_v1 }
 0x3f9   : > { %v705_v3 = vadd.f32 1e-05, %v703_v2 }
 0x3fa   : > { %v702_v4 = vpop.xlane.xlu1 %701 }
 0x3fb   : > { %3239 = vrsqrt.f32 %v705_v3  ;;  %v704_v5 = vmul.f32 0.03125, %v702_v4 }
 0x3fd   : > { %v706_v6 = vadd.f32 1e-05, %v704_v5 }
 0x3ff   : > { %3241 = vrsqrt.f32 %v706_v6 }
 0x405   : > { %v3240_v7 = vpop.eup %3239 }
 0x406   : > { %v709_v8 = vmul.f32 %v3240_v7, %v693_v54 }
 0x408   : > { %v715_v12 = vmul.f32 %v2726_v9, %v709_v8 }
 0x409   : > { %v3242_v10 = vpop.eup %3241 }
 0x40a   : > { %v710_v11 = vmul.f32 %v3242_v10, %v694_v58  ;;  %v721_v15 = vadd.f32 %v2727_v13, %v715_v12 }
 0x40c   : > { %v716_v14 = vmul.f32 %v2726_v9, %v710_v11 }
 0x40e   : > { %v722_v16 = vadd.f32 %v2727_v13, %v716_v14 }
 0x410   : > { %v723_v17 = vpack.c.bf16 %v722_v16, %v721_v15 }
 0x412   : > { %2926 = vmatmul.mubr.msk.bf16.vlgmr.msra.gmra.mrb[0].mxu1 %vm416_vm3, %v723_v17 }
 0x413   : > { %2933 = vmatprep.mubr.msk.bf16.mxu1 %vm3400_vm1, %v3399_v0  ;;  %2930 = vmatpush3.bf16.msra.mxu1 %v3203_v37 }
 0x414   : > { %2931 = vmatprep.subr.bf16.mxu1 %v3399_v0 }
 0x417   : > { %2932 = vmatpush3.bf16.msra.mxu1 %v3204_v38 }
 0x418   : > { %2943 = vmatprep.subr.bf16.mxu1 %v3399_v0 }
 0x4e5   : > { %v782_v19 = vpop.f32.mrb[0].mxu1 }
 0x4e6   : > { %v783_v20 = vadd.f32 %v2728_v18, %v782_v19  ;;  %v2927_v21 = vpop.f32.mrb[1].mxu1 }
 0x4e7   : > { %v785_v22 = vpop.f32.mrb[2].mxu1 }
 0x4e8   : > { %v786_v23 = vadd.f32 %v2728_v18, %v785_v22  ;;  %v2928_v24 = vpop.f32.mrb[3].mxu1  ;;  %v791_v25 = vsel %vm416_vm3, %v783_v20, 0.0 }
 0x4e9   : > { %792 = vadd.xlane.f32.xlu1 %v791_v25 }
 0x4ea   : > { %v794_v26 = vsel %vm416_vm3, %v786_v23, 0.0 }
 0x4ed   : > { %795 = vadd.xlane.f32.xlu1 %v794_v26 }
 0x576   : > { %v793_v27 = vpop.xlane.xlu1 %792 }
 0x577   : > { %v797_v28 = vmul.f32 0.03125, %v793_v27 }
 0x579   : > { %v799_v29 = vsub.f32 %v783_v20, %v797_v28 }
 0x57a   : > { %v796_v30 = vpop.xlane.xlu1 %795 }
 0x57b   : > { %v798_v31 = vmul.f32 0.03125, %v796_v30  ;;  %v801_v32 = vmul.f32 %v799_v29, %v799_v29 }
 0x57d   : > { %v800_v33 = vsub.f32 %v786_v23, %v798_v31  ;;  %v803_v34 = vsel %vm416_vm3, %v801_v32, 0.0 }
 0x57e   : > { %804 = vadd.xlane.f32.xlu1 %v803_v34 }
 0x57f   : > { %v802_v35 = vmul.f32 %v800_v33, %v800_v33 }
 0x581   : > { %v806_v36 = vsel %vm416_vm3, %v802_v35, 0.0 }
 0x582   : > { %807 = vadd.xlane.f32.xlu1 %v806_v36 }
 0x60b   : > { %v805_v39 = vpop.xlane.xlu1 %804 }
 0x60c   : > { %v809_v40 = vmul.f32 0.03125, %v805_v39 }
 0x60e   : > { %v811_v41 = vadd.f32 1e-05, %v809_v40 }
 0x60f   : > { %v808_v42 = vpop.xlane.xlu1 %807 }
 0x610   : > { %3243 = vrsqrt.f32 %v811_v41  ;;  %v810_v43 = vmul.f32 0.03125, %v808_v42 }
 0x612   : > { %v812_v44 = vadd.f32 1e-05, %v810_v43 }
 0x614   : > { %3245 = vrsqrt.f32 %v812_v44 }
 0x61a   : > { %v3244_v45 = vpop.eup %3243 }
 0x61b   : > { %v815_v46 = vmul.f32 %v3244_v45, %v799_v29 }
 0x61d   : > { %v821_v49 = vmul.f32 %v2732_v47, %v815_v46 }
 0x61e   : > { %v3246_v48 = vpop.eup %3245 }
 0x61f   : > { %v816_v50 = vmul.f32 %v3246_v48, %v800_v33  ;;  %v3630_v53 = vadd.f32 %v2733_v51, %v821_v49 }
 0x621   : > { %v822_v52 = vmul.f32 %v2732_v47, %v816_v50 }
 0x623   : > { %v3632_v54 = vadd.f32 %v2733_v51, %v822_v52 }
 0x625   : > { %v829_v55 = vpack.c.bf16 %v3632_v54, %v3630_v53 }
 0x627   : > { %2934 = vmatmul.mubr.msk.bf16.vlgmr.msra.gmra.mrb[4].mxu1 %vm416_vm3, %v829_v55 }
 0x628   : > { %2945 = vmatprep.mubr.msk.bf16.mxu1 %vm3400_vm1, %v3399_v0 }
 0x6fa   : > { %v888_v57 = vpop.f32.mrb[4].mxu1 }
 0x6fb   : > { %v2935_v58 = vpop.f32.mrb[5].mxu1  ;;  %v889_v60 = vadd.f32 %v2734_v56, %v888_v57 }
 0x6fc   : > { %v891_v59 = vpop.f32.mrb[6].mxu1 }
 0x6fd   : > { %v892_v61 = vadd.f32 %v2734_v56, %v891_v59  ;;  %v2936_v62 = vpop.f32.mrb[7].mxu1 }
 0x6ff   : > { %v3642_v63 = vpack.c.bf16 %v892_v61, %v889_v60 }
 0x701   : > { %1020 = vrot.lane.b32.xlu0 %v3642_v63, %s3403_s16  ;;  %897 = vrot.lane.b32.xlu1 %v3642_v63, %s3404_s17 }
 0x705   : > { %1260 = vrot.lane.b32.xlu0 %v3642_v63, %s3405_s22  ;;  %1018 = vrot.lane.b32.xlu1 %v3642_v63, %s3406_s23 }
 0x709   : > { %1141 = vrot.lane.b32.xlu1 %v3642_v63, %s4056_s24 }
 0x70d   : > { %1139 = vrot.lane.b32.xlu1 %v3642_v63, %s3408_s25 }
 0x711   : > { %1262 = vrot.lane.b32.xlu1 %v3642_v63, %s4055_s26  ;;  %s4066_s26 = smov 16  }
 0x773   : > { %v898_v1 = vpop.permute.xlu1 %897  ;;  %v1021_v4 = vpop.permute.xlu0 %1020 }
 0x774   : > { %v904_v2 = vsel %vm899_vm7, %v898_v1, 0  ;;  %v1026_v5 = vsel %vm899_vm7, %v1021_v4, 0 }
 0x775   : > { %2938 = vmatpush3.bf16.xpose.msra.mxu0 %v904_v2 }
 0x776   : > { %2949 = vmatprep.subr.bf16.mxu0 %v3399_v0 }
 0x777   : > { %v1019_v3 = vpop.permute.xlu1 %1018  ;;  %v1261_v11 = vpop.permute.xlu0 %1260 }
 0x77b   : > { %v1142_v6 = vpop.permute.xlu1 %1141 }
 0x77c   : > { %2940 = vmatmul.mubr.msk.bf16.vlgmr.msra.gmra.mrb[16].mxu0 %vm899_vm7, %v3642_v63  ;;  %v1147_v8 = vsel %vm899_vm7, %v1142_v6, 0 }
 0x77d   : > { %2950 = vmatpush3.bf16.xpose.msra.mxu0 %v1026_v5  ;;  %2951 = vmatprep.mubr.msk.bf16.mxu0 %vm3400_vm1, %v3399_v0 }
 0x77e   : > { %2961 = vmatprep.subr.bf16.mxu0 %v3399_v0 }
 0x77f   : > { %v1140_v7 = vpop.permute.xlu1 %1139 }
 0x783   : > { %v1263_v9 = vpop.permute.xlu1 %1262 }
 0x784   : > { %2952 = vmatmul.mubr.msk.bf16.vlgmr.msra.gmra.mrb[20].mxu0 %vm899_vm7, %v1019_v3  ;;  %v1268_v10 = vsel %vm899_vm7, %v1263_v9, 0 }
 0x785   : > { %2962 = vmatpush3.bf16.xpose.msra.mxu0 %v1147_v8  ;;  %2963 = vmatprep.mubr.msk.bf16.mxu0 %vm3400_vm1, %v3399_v0 }
 0x786   : > { %2973 = vmatprep.subr.bf16.mxu0 %v3399_v0 }
 0x78c   : > { %2964 = vmatmul.mubr.msk.bf16.vlgmr.msra.gmra.mrb[24].mxu0 %vm899_vm7, %v1140_v7 }
 0x78d   : > { %2974 = vmatpush3.bf16.xpose.msra.mxu0 %v1268_v10  ;;  %2975 = vmatprep.mubr.msk.bf16.mxu0 %vm3400_vm1, %v3399_v0 }
 0x78e   : > { %2985 = vmatprep.subr.bf16.mxu0 %v3399_v0 }
 0x794   : > { %2976 = vmatmul.mubr.msk.bf16.vlgmr.msra.gmra.mrb[28].mxu0 %vm899_vm7, %v1261_v11 }
 0x795   : > { %2989 = vmatprep.mubr.msk.bf16.mxu0 %vm3400_vm1, %v3399_v0 }
 0x84f   : > { %v940_v12 = vpop.f32.mrb[16].mxu0 }
 0x850   : > { %v2941_v13 = vpop.f32.mrb[17].mxu0  ;;  %v948_v14 = vsel %vm947_vm8, %v940_v12, -inf }
 0x851   : > { %949 = vmax.xlane.f32.xlu1 %v948_v14  ;;  %v943_v15 = vpop.f32.mrb[18].mxu0 }
 0x852   : > { %v2942_v16 = vpop.f32.mrb[19].mxu0  ;;  %v951_v17 = vsel %vm947_vm8, %v943_v15, -inf }
 0x853   : > { %952 = vmax.xlane.f32.xlu0 %v951_v17 }
 0x857   : > { %v1062_v18 = vpop.f32.mrb[20].mxu0 }
 0x858   : > { %v2953_v19 = vpop.f32.mrb[21].mxu0  ;;  %v1069_v20 = vsel %vm947_vm8, %v1062_v18, -inf }
 0x859   : > { %1070 = vmax.xlane.f32.xlu0 %v1069_v20  ;;  %v1065_v21 = vpop.f32.mrb[22].mxu0 }
 0x85a   : > { %v2954_v22 = vpop.f32.mrb[23].mxu0  ;;  %v1072_v23 = vsel %vm947_vm8, %v1065_v21, -inf }
 0x85b   : > { %1073 = vmax.xlane.f32.xlu1 %v1072_v23 }
 0x85f   : > { %v1183_v24 = vpop.f32.mrb[24].mxu0 }
 0x860   : > { %v2965_v25 = vpop.f32.mrb[25].mxu0  ;;  %v1190_v26 = vsel %vm947_vm8, %v1183_v24, -inf }
 0x861   : > { %1191 = vmax.xlane.f32.xlu0 %v1190_v26  ;;  %v1186_v27 = vpop.f32.mrb[26].mxu0 }
 0x862   : > { %v2966_v28 = vpop.f32.mrb[27].mxu0  ;;  %v1193_v29 = vsel %vm947_vm8, %v1186_v27, -inf }
 0x863   : > { %1194 = vmax.xlane.f32.xlu1 %v1193_v29 }
 0x867   : > { %v1304_v30 = vpop.f32.mrb[28].mxu0 }
 0x868   : > { %v2977_v31 = vpop.f32.mrb[29].mxu0  ;;  %v1311_v32 = vsel %vm947_vm8, %v1304_v30, -inf }
 0x869   : > { %1312 = vmax.xlane.f32.xlu0 %v1311_v32  ;;  %v1307_v33 = vpop.f32.mrb[30].mxu0 }
 0x86a   : > { %v2978_v34 = vpop.f32.mrb[31].mxu0  ;;  %v1314_v35 = vsel %vm947_vm8, %v1307_v33, -inf }
 0x86b   : > { %1315 = vmax.xlane.f32.xlu1 %v1314_v35 }
 0x8de   : > { %v950_v36 = vpop.xlane.xlu1 %949 }
 0x8df   : > { %v954_v37 = vsub.f32 %v940_v12, %v950_v36 }
 0x8e0   : > { %v953_v38 = vpop.xlane.xlu0 %952 }
 0x8e1   : > { %v956_v39 = vmul.f32 1.442695, %v954_v37  ;;  %v955_v40 = vsub.f32 %v943_v15, %v953_v38 }
 0x8e3   : > { %3247 = vpow2.f32 %v956_v39  ;;  %v958_v41 = vmul.f32 1.442695, %v955_v40 }
 0x8e5   : > { %3249 = vpow2.f32 %v958_v41 }
 0x8e6   : > { %v1071_v42 = vpop.xlane.xlu0 %1070 }
 0x8e7   : > { %v1075_v43 = vsub.f32 %v1062_v18, %v1071_v42 }
 0x8e8   : > { %v1074_v51 = vpop.xlane.xlu1 %1073 }
 0x8e9   : > { %v1077_v44 = vmul.f32 1.442695, %v1075_v43  ;;  %v1076_v52 = vsub.f32 %v1065_v21, %v1074_v51 }
 0x8eb   : > { %3251 = vpow2.f32 %v1077_v44  ;;  %v1079_v57 = vmul.f32 1.442695, %v1076_v52 }
 0x8ed   : > { %v3248_v45 = vpop.eup %3247  ;;  %3253 = vpow2.f32 %v1079_v57 }
 0x8ee   : > { %v960_v46 = vsel %vm947_vm8, %v3248_v45, 0.0  ;;  %v1192_v56 = vpop.xlane.xlu0 %1191 }
 0x8ef   : > { %v3250_v47 = vpop.eup %3249  ;;  %961 = vadd.xlane.f32.xlu0 %v960_v46  ;;  %v1196_v60 = vsub.f32 %v1183_v24, %v1192_v56  ;;  %v3205_v56 = vld [vmem:[%s4044_s6] sm:$0xff]  }
 0x8f0   : > { %v963_v48 = vsel %vm947_vm8, %v3250_v47, 0.0  ;;  %v1195_v55 = vpop.xlane.xlu1 %1194  ;;  %2986 = vmatpush3.bf16.msra.mxu0 %v3205_v56 }
 0x8f1   : > { %964 = vadd.xlane.f32.xlu1 %v963_v48  ;;  %v1197_v58 = vsub.f32 %v1186_v27, %v1195_v55  ;;  %v1198_v2 = vmul.f32 1.442695, %v1196_v60  ;;  %2987 = vmatprep.subr.bf16.mxu0 %v3399_v0 }
 0x8f3   : > { %v1200_v62 = vmul.f32 1.442695, %v1197_v58 }
 0x8f5   : > { %v3689_v49 = vpop.eup %3251  ;;  %3255 = vpow2.f32 %v1200_v62 }
 0x8f6   : > { %v1081_v50 = vsel %vm947_vm8, %v3689_v49, 0.0  ;;  %v1313_v61 = vpop.xlane.xlu0 %1312  ;;  %3257 = vpow2.f32 %v1198_v2 }
 0x8f7   : > { %1082 = vadd.xlane.f32.xlu0 %v1081_v50  ;;  %v1317_v3 = vsub.f32 %v1304_v30, %v1313_v61  ;;  %v3254_v6 = vpop.eup %3253  ;;  %v3206_v61 = vld [vmem:[%s4044_s6 + $0x8] sm:$0xff]  }
 0x8f8   : > { %v1316_v59 = vpop.xlane.xlu1 %1315  ;;  %v1084_v7 = vsel %vm947_vm8, %v3254_v6, 0.0  ;;  %2988 = vmatpush3.bf16.msra.mxu0 %v3206_v61 }
 0x8f9   : > { %v1318_v1 = vsub.f32 %v1307_v33, %v1316_v59  ;;  %v1319_v5 = vmul.f32 1.442695, %v1317_v3  ;;  %3001 = vmatprep.subr.bf16.mxu0 %v3399_v0 }
 0x8fb   : > { %v1321_v4 = vmul.f32 1.442695, %v1318_v1 }
 0x8fd   : > { %3259 = vpow2.f32 %v1321_v4 }
 0x8fe   : > { %3261 = vpow2.f32 %v1319_v5 }
 0x8ff   : > { %v3256_v8 = vpop.eup %3255 }
 0x900   : > { %v3258_v9 = vpop.eup %3257  ;;  %v1205_v10 = vsel %vm947_vm8, %v3256_v8, 0.0 }
 0x901   : > { %v1202_v12 = vsel %vm947_vm8, %v3258_v9, 0.0 }
 0x902   : > { %1092 = vrot.lane.b32.xlu1 %v3642_v63, %s4051_s27  ;;  %s4065_s27 = smov 8  }
 0x907   : > { %v3699_v11 = vpop.eup %3259 }
 0x908   : > { %v3262_v13 = vpop.eup %3261  ;;  %v1326_v14 = vsel %vm947_vm8, %v3699_v11, 0.0 }
 0x909   : > { %v1323_v15 = vsel %vm947_vm8, %v3262_v13, 0.0 }
 0x90d   : > { %971 = vrot.lane.b32.xlu0 %v3642_v63, %s4050_s21  ;;  %s4060_s21 = smov 72  }
 0x926   : > { %1085 = vadd.xlane.f32.xlu1 %v1084_v7 }
 0x92a   : > { %1206 = vadd.xlane.f32.xlu1 %v1205_v10 }
 0x92c   : > { %1203 = vadd.xlane.f32.xlu0 %v1202_v12 }
 0x92e   : > { %1327 = vadd.xlane.f32.xlu1 %v1326_v14 }
 0x930   : > { %1324 = vadd.xlane.f32.xlu0 %v1323_v15 }
 0x93f   : > { %1213 = vrot.lane.b32.xlu1 %v3642_v63, %s4049_s28  ;;  %s4054_s28 = smov 8  }
 0x946   : > { %1334 = vrot.lane.b32.xlu0 %v3642_v63, %s4048_s29  ;;  %s4053_s29 = smov 16  }
 0x97c   : > { %v962_v16 = vpop.xlane.xlu0 %961 }
 0x97d   : > { %3263 = vrcp.f32 %v962_v16 }
 0x97e   : > { %v965_v17 = vpop.xlane.xlu1 %964 }
 0x97f   : > { %3265 = vrcp.f32 %v965_v17 }
 0x982   : > { %v1093_v25 = vpop.permute.xlu1 %1092 }
 0x984   : > { %v1083_v18 = vpop.xlane.xlu0 %1082 }
 0x985   : > { %3267 = vrcp.f32 %v1083_v18 }
 0x987   : > { %v3264_v19 = vpop.eup %3263 }
 0x988   : > { %v972_v20 = vpop.permute.xlu0 %971  ;;  %v968_v22 = vmul.f32 %v3264_v19, %v3248_v45 }
 0x989   : > { %v3266_v21 = vpop.eup %3265  ;;  %2944 = vmatpush3.bf16.msra.mxu1 %v972_v20 }
 0x98a   : > { %v969_v23 = vmul.f32 %v3266_v21, %v3250_v47  ;;  %2955 = vmatprep.subr.bf16.mxu1 %v3399_v0 }
 0x98c   : > { %v970_v24 = vpack.c.bf16 %v969_v23, %v968_v22 }
 0x98e   : > { %2946 = vmatmul.mubr.msk.bf16.vlgmr.msra.gmra.mrb[8].mxu1 %vm947_vm8, %v970_v24  ;;  %v2746_v24 = vld [vmem:[%s4039_s1 + $0x8] ss:$0 sm:$0xff] }
 0x98f   : > { %2956 = vmatpush3.bf16.msra.mxu1 %v1093_v25  ;;  %2957 = vmatprep.mubr.msk.bf16.mxu1 %vm3400_vm1, %v3399_v0  ;;  %v3268_v28 = vpop.eup %3267 }
 0x990   : > { %2967 = vmatprep.subr.bf16.mxu1 %v3399_v0  ;;  %v1089_v32 = vmul.f32 %v3268_v28, %v3689_v49 }
 0x9b3   : > { %v1086_v63 = vpop.xlane.xlu1 %1085 }
 0x9b4   : > { %3269 = vrcp.f32 %v1086_v63 }
 0x9b7   : > { %v1207_v26 = vpop.xlane.xlu1 %1206 }
 0x9b8   : > { %3271 = vrcp.f32 %v1207_v26 }
 0x9b9   : > { %v1204_v27 = vpop.xlane.xlu0 %1203 }
 0x9ba   : > { %3273 = vrcp.f32 %v1204_v27 }
 0x9bb   : > { %v1328_v29 = vpop.xlane.xlu1 %1327 }
 0x9bd   : > { %v1325_v30 = vpop.xlane.xlu0 %1324 }
 0x9be   : > { %v3270_v31 = vpop.eup %3269  ;;  %3275 = vrcp.f32 %v1325_v30 }
 0x9bf   : > { %v1090_v33 = vmul.f32 %v3270_v31, %v3254_v6  ;;  %3277 = vrcp.f32 %v1328_v29  ;;  %v1214_v36 = vpop.permute.xlu1 %1213 }
 0x9c1   : > { %v1091_v34 = vpack.c.bf16 %v1090_v33, %v1089_v32  ;;  %v1335_v42 = vpop.permute.xlu0 %1334 }
 0x9c2   : > { %v3272_v35 = vpop.eup %3271 }
 0x9c3   : > { %2958 = vmatmul.mubr.msk.bf16.vlgmr.msra.gmra.mrb[12].mxu1 %vm947_vm8, %v1091_v34  ;;  %v1211_v39 = vmul.f32 %v3272_v35, %v3256_v8 }
 0x9c4   : > { %v3274_v37 = vpop.eup %3273  ;;  %2968 = vmatpush3.bf16.msra.mxu1 %v1214_v36  ;;  %2969 = vmatprep.mubr.msk.bf16.mxu1 %vm3400_vm1, %v3399_v0 }
 0x9c5   : > { %v1210_v38 = vmul.f32 %v3274_v37, %v3258_v9  ;;  %2979 = vmatprep.subr.bf16.mxu1 %v3399_v0 }
 0x9c7   : > { %v1212_v40 = vpack.c.bf16 %v1211_v39, %v1210_v38 }
 0x9c8   : > { %v3276_v41 = vpop.eup %3275 }
 0x9c9   : > { %v3278_v43 = vpop.eup %3277  ;;  %v1331_v44 = vmul.f32 %v3276_v41, %v3262_v13 }
 0x9ca   : > { %v1332_v45 = vmul.f32 %v3278_v43, %v3699_v11  ;;  %v3208_v43 = vld [vmem:[%s4045_s7 + $0x8] sm:$0xff]  }
 0x9cb   : > { %2970 = vmatmul.mubr.msk.bf16.vlgmr.msra.gmra.mrb[16].mxu1 %vm947_vm8, %v1212_v40 }
 0x9cc   : > { %2980 = vmatpush3.bf16.msra.mxu1 %v1335_v42  ;;  %2981 = vmatprep.mubr.msk.bf16.mxu1 %vm3400_vm1, %v3399_v0  ;;  %v1333_v46 = vpack.c.bf16 %v1332_v45, %v1331_v44 }
 0x9cd   : > { %2993 = vmatprep.subr.bf16.mxu1 %v3399_v0 }
 0x9d3   : > { %2982 = vmatmul.mubr.msk.bf16.vlgmr.msra.gmra.mrb[20].mxu1 %vm947_vm8, %v1333_v46 }
 0x9d4   : > { %2997 = vmatprep.mubr.msk.bf16.mxu1 %vm3400_vm1, %v3399_v0 }
 0xa61   : > { %v1011_v47 = vpop.f32.mrb[8].mxu1 }
 0xa62   : > { %v2947_v48 = vpop.f32.mrb[9].mxu1 }
 0xa63   : > { %v1014_v49 = vpop.f32.mrb[10].mxu1 }
 0xa64   : > { %v2948_v50 = vpop.f32.mrb[11].mxu1 }
 0xa96   : > { %v1132_v51 = vpop.f32.mrb[12].mxu1 }
 0xa97   : > { %v2959_v52 = vpop.f32.mrb[13].mxu1 }
 0xa98   : > { %v1135_v55 = vpop.f32.mrb[14].mxu1  ;;  %v2750_v52 = vld [vmem:[%s4039_s1 + $0x9] ss:$0 sm:$0xff] }
 0xa99   : > { %v3164_v57 = vpack.i.bf16 %v1135_v55, %v1132_v51  ;;  %v2960_v58 = vpop.f32.mrb[15].mxu1 }
 0xa9a   : > { %v2751_v58 = vld [vmem:[%s4039_s1 + $0xa] ss:$0 sm:$0xff] }
 0xa9b   : > { %3165 = vrot.lane.b32.xlu1 %v3164_v57, %s4054_s28  ;;  %s4059_s28 = smov 80  }
 0xa9e   : > { %v1253_v59 = vpop.f32.mrb[16].mxu1 }
 0xa9f   : > { %v2971_v60 = vpop.f32.mrb[17].mxu1 }
 0xaa0   : > { %v1256_v62 = vpop.f32.mrb[18].mxu1 }
 0xaa1   : > { %v3169_v1 = vpack.i.bf16 %v1256_v62, %v1253_v59  ;;  %v2972_v2 = vpop.f32.mrb[19].mxu1 }
 0xaa2   : > { %v3210_v2 = vld [vmem:[%s4046_s8 + $0x8] sm:$0xff]  }
 0xaa3   : > { %3170 = vrot.lane.b32.xlu0 %v3169_v1, %s4053_s29  ;;  %v3209_v1 = vld [vmem:[%s4046_s8] sm:$0xff]  }
 0xaa6   : > { %v1374_v3 = vpop.f32.mrb[20].mxu1 }
 0xaa7   : > { %v2983_v4 = vpop.f32.mrb[21].mxu1 }
 0xaa8   : > { %v1377_v5 = vpop.f32.mrb[22].mxu1  ;;  %v3212_v4 = vld [vmem:[%s4046_s8 + $0x18] sm:$0xff]  }
 0xaa9   : > { %v3174_v6 = vpack.i.bf16 %v1377_v5, %v1374_v3  ;;  %v2984_v7 = vpop.f32.mrb[23].mxu1  ;;  %v3211_v3 = vld [vmem:[%s4046_s8 + $0x10] sm:$0xff]   ;;  %v2752_v5 = vld [vmem:[%s4039_s1 + $0xb] ss:$0 sm:$0xff] }
 0xaab   : > { %3175 = vrot.lane.b32.xlu1 %v3174_v6, %s4052_s14 }
 0xb0d   : > { %v3166_v8 = vpop.permute.xlu1 %3165 }
 0xb0e   : > { %v3168_v10 = vunpack.i.h.bf16 %v3166_v8  ;;  %v3167_v11 = vunpack.i.l.bf16 %v3166_v8 }
 0xb10   : > { %v1406_v15 = vsel %vm899_vm7, %v1014_v49, %v3168_v10  ;;  %v1405_v16 = vsel %vm899_vm7, %v1011_v47, %v3167_v11 }
 0xb15   : > { %v3171_v9 = vpop.permute.xlu0 %3170 }
 0xb16   : > { %v3173_v12 = vunpack.i.h.bf16 %v3171_v9  ;;  %v3172_v13 = vunpack.i.l.bf16 %v3171_v9 }
 0xb18   : > { %v1407_v19 = vsel %vm947_vm8, %v1405_v16, %v3172_v13  ;;  %v1408_v20 = vsel %vm947_vm8, %v1406_v15, %v3173_v12 }
 0xb1d   : > { %v3176_v14 = vpop.permute.xlu1 %3175 }
 0xb1e   : > { %v3178_v17 = vunpack.i.h.bf16 %v3176_v14  ;;  %v3177_v18 = vunpack.i.l.bf16 %v3176_v14 }
 0xb20   : > { %v1410_v21 = vsel %vm1409_vm9, %v1407_v19, %v3177_v18  ;;  %v1411_v22 = vsel %vm1409_vm9, %v1408_v20, %v3178_v17 }
 0xb21   : > { %v1412_v23 = vpack.c.bf16 %v1411_v22, %v1410_v21 }
 0xb23   : > { %2990 = vmatmul.mubr.msk.bf16.vlgmr.msra.gmra.mrb[32].mxu0 %vm416_vm3, %v1412_v23 }
 0xb24   : > { %3009 = vmatprep.mubr.msk.bf16.mxu0 %vm3400_vm1, %v3399_v0  ;;  %3002 = vmatpush3.bf16.msra.mxu0 %v3209_v1 }
 0xb25   : > { %3003 = vmatprep.subr.bf16.mxu0 %v3399_v0 }
 0xb28   : > { %3004 = vmatpush3.bf16.msra.mxu0 %v3210_v2 }
 0xb29   : > { %3005 = vmatprep.subr.bf16.mxu0 %v3399_v0 }
 0xb2c   : > { %3006 = vmatpush3.bf16.msra.mxu0 %v3211_v3  ;;  %v2763_v3 = vld [vmem:[%s4039_s1 + $0xe] ss:$0 sm:$0xff] }
 0xb2d   : > { %3007 = vmatprep.subr.bf16.mxu0 %v3399_v0 }
 0xb30   : > { %3008 = vmatpush3.bf16.msra.mxu0 %v3212_v4 }
 0xb31   : > { %3027 = vmatprep.subr.bf16.mxu0 %v3399_v0 }
 0xbf6   : > { %v1471_v25 = vpop.f32.mrb[32].mxu0 }
 0xbf7   : > { %v1472_v63 = vadd.f32 %v2746_v24, %v1471_v25  ;;  %v2991_v26 = vpop.f32.mrb[33].mxu0 }
 0xbf8   : > { %v1474_v27 = vpop.f32.mrb[34].mxu0 }
 0xbf9   : > { %v1475_v28 = vadd.f32 %v2746_v24, %v1474_v27  ;;  %v2992_v29 = vpop.f32.mrb[35].mxu0  ;;  %v1478_v30 = vadd.f32 %v1472_v63, %v3630_v53 }
 0xbfb   : > { %v1482_v31 = vsel %vm416_vm3, %v1478_v30, 0.0  ;;  %v1479_v32 = vadd.f32 %v1475_v28, %v3632_v54  ;;  %v3207_v54 = vld [vmem:[%s4045_s7] sm:$0xff]  }
 0xbfc   : > { %1483 = vadd.xlane.f32.xlu0 %v1482_v31  ;;  %2994 = vmatpush3.bf16.msra.mxu1 %v3207_v54 }
 0xbfd   : > { %v1485_v33 = vsel %vm416_vm3, %v1479_v32, 0.0  ;;  %2995 = vmatprep.subr.bf16.mxu1 %v3399_v0 }
 0xbfe   : > { %1486 = vadd.xlane.f32.xlu1 %v1485_v33 }
 0xc00   : > { %2996 = vmatpush3.bf16.msra.mxu1 %v3208_v43 }
 0xc01   : > { %3013 = vmatprep.subr.bf16.mxu1 %v3399_v0 }
 0xc89   : > { %v1484_v34 = vpop.xlane.xlu0 %1483 }
 0xc8a   : > { %v1488_v35 = vmul.f32 0.03125, %v1484_v34 }
 0xc8b   : > { %v1487_v36 = vpop.xlane.xlu1 %1486 }
 0xc8c   : > { %v1490_v37 = vsub.f32 %v1478_v30, %v1488_v35  ;;  %v1489_v38 = vmul.f32 0.03125, %v1487_v36  ;;  %v2756_v30 = vld [vmem:[%s4039_s1 + $0xc] ss:$0 sm:$0xff] }
 0xc8e   : > { %v1491_v39 = vsub.f32 %v1479_v32, %v1489_v38  ;;  %v1492_v40 = vmul.f32 %v1490_v37, %v1490_v37 }
 0xc90   : > { %v1494_v41 = vsel %vm416_vm3, %v1492_v40, 0.0  ;;  %v1493_v42 = vmul.f32 %v1491_v39, %v1491_v39 }
 0xc91   : > { %1495 = vadd.xlane.f32.xlu0 %v1494_v41 }
 0xc92   : > { %v1497_v53 = vsel %vm416_vm3, %v1493_v42, 0.0 }
 0xc95   : > { %1498 = vadd.xlane.f32.xlu0 %v1497_v53 }
 0xd1e   : > { %v1496_v44 = vpop.xlane.xlu0 %1495 }
 0xd1f   : > { %v1500_v45 = vmul.f32 0.03125, %v1496_v44 }
 0xd21   : > { %v1502_v46 = vadd.f32 1e-05, %v1500_v45 }
 0xd22   : > { %v1499_v47 = vpop.xlane.xlu0 %1498 }
 0xd23   : > { %3279 = vrsqrt.f32 %v1502_v46  ;;  %v1501_v48 = vmul.f32 0.03125, %v1499_v47 }
 0xd25   : > { %v1503_v49 = vadd.f32 1e-05, %v1501_v48 }
 0xd27   : > { %3281 = vrsqrt.f32 %v1503_v49  ;;  %v3213_v49 = vld [vmem:[%s4043_s5 + $0x10] sm:$0xff]  }
 0xd2d   : > { %v3280_v50 = vpop.eup %3279 }
 0xd2e   : > { %v1506_v51 = vmul.f32 %v3280_v50, %v1490_v37  ;;  %v3214_v50 = vld [vmem:[%s4043_s5 + $0x18] sm:$0xff]  }
 0xd30   : > { %v1512_v56 = vmul.f32 %v2750_v52, %v1506_v51 }
 0xd31   : > { %v3282_v55 = vpop.eup %3281 }
 0xd32   : > { %v1507_v57 = vmul.f32 %v3282_v55, %v1491_v39  ;;  %v1518_v60 = vadd.f32 %v2751_v58, %v1512_v56 }
 0xd34   : > { %v1513_v59 = vmul.f32 %v2750_v52, %v1507_v57 }
 0xd36   : > { %v1519_v61 = vadd.f32 %v2751_v58, %v1513_v59 }
 0xd38   : > { %v1520_v62 = vpack.c.bf16 %v1519_v61, %v1518_v60 }
 0xd3a   : > { %2998 = vmatmul.mubr.msk.bf16.vlgmr.msra.gmra.mrb[24].mxu1 %vm416_vm3, %v1520_v62 }
 0xd3b   : > { %3017 = vmatprep.mubr.msk.bf16.mxu1 %vm3400_vm1, %v3399_v0  ;;  %3014 = vmatpush3.bf16.msra.mxu1 %v3213_v49 }
 0xd3c   : > { %3015 = vmatprep.subr.bf16.mxu1 %v3399_v0 }
 0xd3f   : > { %3016 = vmatpush3.bf16.msra.mxu1 %v3214_v50 }
 0xd40   : > { %3021 = vmatprep.subr.bf16.mxu1 %v3399_v0 }
 0xe0d   : > { %v1579_v6 = vpop.f32.mrb[24].mxu1 }
 0xe0e   : > { %v1580_v7 = vadd.f32 %v2752_v5, %v1579_v6  ;;  %v2999_v8 = vpop.f32.mrb[25].mxu1 }
 0xe0f   : > { %v1582_v9 = vpop.f32.mrb[26].mxu1  ;;  %v2768_v8 = vld [vmem:[%s4039_s1 + $0xf] ss:$0 sm:$0xff] }
 0xe10   : > { %v1586_v10 = vmul.f32 %v1580_v7, %v1580_v7  ;;  %v1583_v11 = vadd.f32 %v2752_v5, %v1582_v9  ;;  %v3000_v12 = vpop.f32.mrb[27].mxu1 }
 0xe12   : > { %v1588_v13 = vmul.f32 %v1586_v10, %v1580_v7  ;;  %v1587_v14 = vmul.f32 %v1583_v11, %v1583_v11 }
 0xe14   : > { %v1590_v15 = vmul.f32 0.044715, %v1588_v13  ;;  %v1589_v16 = vmul.f32 %v1587_v14, %v1583_v11 }
 0xe16   : > { %v1592_v17 = vadd.f32 %v1590_v15, %v1580_v7  ;;  %v1591_v18 = vmul.f32 0.044715, %v1589_v16 }
 0xe18   : > { %v1594_v19 = vmul.f32 0.7978846, %v1592_v17  ;;  %v1593_v20 = vadd.f32 %v1591_v18, %v1583_v11 }
 0xe1a   : > { %3283 = vtanh.f32 %v1594_v19  ;;  %v1595_v21 = vmul.f32 0.7978846, %v1593_v20 }
 0xe1c   : > { %3285 = vtanh.f32 %v1595_v21 }
 0xe24   : > { %v3284_v22 = vpop.eup %3283 }
 0xe25   : > { %v1598_v23 = vadd.f32 1.0, %v3284_v22 }
 0xe26   : > { %v3286_v24 = vpop.eup %3285 }
 0xe27   : > { %v1600_v25 = vmul.f32 0.5, %v1598_v23  ;;  %v1599_v63 = vadd.f32 1.0, %v3286_v24 }
 0xe29   : > { %v1601_v26 = vmul.f32 0.5, %v1599_v63  ;;  %v1602_v27 = vmul.f32 %v1600_v25, %v1580_v7 }
 0xe2b   : > { %v1603_v28 = vmul.f32 %v1601_v26, %v1583_v11 }
 0xe2d   : > { %v1604_v29 = vpack.c.bf16 %v1603_v28, %v1602_v27 }
 0xe2f   : > { %3010 = vmatmul.mubr.msk.bf16.vlgmr.msra.gmra.mrb[36].mxu0 %vm567_vm5, %v1604_v29 }
 0xe30   : > { %3029 = vmatprep.mubr.msk.bf16.mxu0 %vm3400_vm1, %v3399_v0 }
 0xf02   : > { %v1679_v31 = vpop.f32.mrb[36].mxu0 }
 0xf03   : > { %v1680_v32 = vadd.f32 %v2756_v30, %v1679_v31  ;;  %v3011_v33 = vpop.f32.mrb[37].mxu0 }
 0xf04   : > { %v1682_v34 = vpop.f32.mrb[38].mxu0 }
 0xf05   : > { %v1683_v35 = vadd.f32 %v2756_v30, %v1682_v34  ;;  %v3012_v36 = vpop.f32.mrb[39].mxu0  ;;  %v1686_v37 = vadd.f32 %v1680_v32, %v1518_v60  ;;  %v2762_v60 = vld [vmem:[%s4039_s1 + $0xd] ss:$0 sm:$0xff] }
 0xf07   : > { %v1690_v38 = vsel %vm416_vm3, %v1686_v37, 0.0  ;;  %v1687_v39 = vadd.f32 %v1683_v35, %v1519_v61 }
 0xf08   : > { %1691 = vadd.xlane.f32.xlu1 %v1690_v38 }
 0xf09   : > { %v1693_v40 = vsel %vm416_vm3, %v1687_v39, 0.0 }
 0xf0a   : > { %1694 = vadd.xlane.f32.xlu0 %v1693_v40 }
 0xf95   : > { %v1692_v41 = vpop.xlane.xlu1 %1691 }
 0xf96   : > { %v1696_v42 = vmul.f32 0.03125, %v1692_v41 }
 0xf97   : > { %v1695_v53 = vpop.xlane.xlu0 %1694 }
 0xf98   : > { %v1698_v54 = vsub.f32 %v1686_v37, %v1696_v42  ;;  %v1697_v43 = vmul.f32 0.03125, %v1695_v53 }
 0xf9a   : > { %v1699_v44 = vsub.f32 %v1687_v39, %v1697_v43  ;;  %v1700_v45 = vmul.f32 %v1698_v54, %v1698_v54 }
 0xf9c   : > { %v1702_v46 = vsel %vm416_vm3, %v1700_v45, 0.0  ;;  %v1701_v47 = vmul.f32 %v1699_v44, %v1699_v44 }
 0xf9d   : > { %1703 = vadd.xlane.f32.xlu1 %v1702_v46 }
 0xf9e   : > { %v1705_v48 = vsel %vm416_vm3, %v1701_v47, 0.0 }
 0xf9f   : > { %1706 = vadd.xlane.f32.xlu0 %v1705_v48 }
0x102a   : > { %v1704_v51 = vpop.xlane.xlu1 %1703 }
0x102b   : > { %v1708_v52 = vmul.f32 0.03125, %v1704_v51 }
0x102c   : > { %v1707_v55 = vpop.xlane.xlu0 %1706 }
0x102d   : > { %v1710_v56 = vadd.f32 1e-05, %v1708_v52  ;;  %v1709_v57 = vmul.f32 0.03125, %v1707_v55 }
0x102f   : > { %3287 = vrsqrt.f32 %v1710_v56  ;;  %v1711_v58 = vadd.f32 1e-05, %v1709_v57 }
0x1031   : > { %3289 = vrsqrt.f32 %v1711_v58 }
0x1039   : > { %v3288_v59 = vpop.eup %3287 }
0x103a   : > { %v1714_v61 = vmul.f32 %v3288_v59, %v1698_v54 }
0x103b   : > { %v3290_v62 = vpop.eup %3289 }
0x103c   : > { %v1720_v1 = vmul.f32 %v2762_v60, %v1714_v61  ;;  %v1715_v2 = vmul.f32 %v3290_v62, %v1699_v44 }
0x103e   : > { %v1721_v4 = vmul.f32 %v2762_v60, %v1715_v2  ;;  %v3816_v5 = vadd.f32 %v2763_v3, %v1720_v1 }
0x1040   : > { %v3818_v6 = vadd.f32 %v2763_v3, %v1721_v4 }
0x1042   : > { %v1728_v7 = vpack.c.bf16 %v3818_v6, %v3816_v5 }
0x1044   : > { %3018 = vmatmul.mubr.msk.bf16.vlgmr.msra.gmra.mrb[28].mxu1 %vm416_vm3, %v1728_v7 }
0x1045   : > { %3023 = vmatprep.mubr.msk.bf16.mxu1 %vm3400_vm1, %v3399_v0 }
0x1117   : > { %v1788_v9 = vpop.f32.mrb[28].mxu1 }
0x1118   : > { %v3019_v10 = vpop.f32.mrb[29].mxu1  ;;  %v1789_v12 = vadd.f32 %v2768_v8, %v1788_v9 }
0x1119   : > { %v1791_v11 = vpop.f32.mrb[30].mxu1 }
0x111a   : > { %v1792_v13 = vadd.f32 %v2768_v8, %v1791_v11  ;;  %v3020_v14 = vpop.f32.mrb[31].mxu1 }
0x111c   : > { %v3828_v15 = vpack.c.bf16 %v1792_v13, %v1789_v12 }
0x111e   : > { %1918 = vrot.lane.b32.xlu0 %v3828_v15, %s3403_s16  ;;  %1797 = vrot.lane.b32.xlu1 %v3828_v15, %s3404_s17  ;;  %s4061_s16 = smov 56   ;;  %s4062_s17 = smov 64  }
0x1122   : > { %2037 = vrot.lane.b32.xlu0 %v3828_v15, %s3408_s25  ;;  %1916 = vrot.lane.b32.xlu1 %v3828_v15, %s3406_s23  ;;  %s4064_s23 = smov 40  }
0x1126   : > { %2158 = vrot.lane.b32.xlu0 %v3828_v15, %s3405_s22  ;;  %2039 = vrot.lane.b32.xlu1 %v3828_v15, %s4059_s28  ;;  %s4063_s22 = smov 48   ;;  %s4067_s28 = smov 24  }
0x112a   : > { %2160 = vrot.lane.b32.xlu1 %v3828_v15, %s4060_s21 }
0x1190   : > { %v1798_v16 = vpop.permute.xlu1 %1797  ;;  %v1919_v18 = vpop.permute.xlu0 %1918 }
0x1191   : > { %v1803_v17 = vsel %vm899_vm7, %v1798_v16, 0  ;;  %v1924_v20 = vsel %vm899_vm7, %v1919_v18, 0 }
0x1192   : > { %3022 = vmatpush3.bf16.xpose.msra.mxu1 %v1803_v17 }
0x1193   : > { %3033 = vmatprep.subr.bf16.mxu1 %v3399_v0 }
0x1194   : > { %v1917_v19 = vpop.permute.xlu1 %1916  ;;  %v2038_v24 = vpop.permute.xlu0 %2037 }
0x1198   : > { %v2040_v21 = vpop.permute.xlu1 %2039  ;;  %v2159_v63 = vpop.permute.xlu0 %2158 }
0x1199   : > { %3024 = vmatmul.mubr.msk.bf16.vlgmr.msra.gmra.mrb[32].mxu1 %vm899_vm7, %v3828_v15  ;;  %v2045_v22 = vsel %vm899_vm7, %v2040_v21, 0 }
0x119a   : > { %3034 = vmatpush3.bf16.xpose.msra.mxu1 %v1924_v20  ;;  %3035 = vmatprep.mubr.msk.bf16.mxu1 %vm3400_vm1, %v3399_v0 }
0x119b   : > { %3045 = vmatprep.subr.bf16.mxu1 %v3399_v0 }
0x119c   : > { %v2161_v23 = vpop.permute.xlu1 %2160 }
0x119d   : > { %v2166_v25 = vsel %vm899_vm7, %v2161_v23, 0 }
0x11a1   : > { %3036 = vmatmul.mubr.msk.bf16.vlgmr.msra.gmra.mrb[36].mxu1 %vm899_vm7, %v1917_v19 }
0x11a2   : > { %3046 = vmatpush3.bf16.xpose.msra.mxu1 %v2045_v22  ;;  %3047 = vmatprep.mubr.msk.bf16.mxu1 %vm3400_vm1, %v3399_v0 }
0x11a3   : > { %3057 = vmatprep.subr.bf16.mxu1 %v3399_v0 }
0x11a9   : > { %3048 = vmatmul.mubr.msk.bf16.vlgmr.msra.gmra.mrb[40].mxu1 %vm899_vm7, %v2038_v24 }
0x11aa   : > { %3058 = vmatpush3.bf16.xpose.msra.mxu1 %v2166_v25  ;;  %3059 = vmatprep.mubr.msk.bf16.mxu1 %vm3400_vm1, %v3399_v0 }
0x11ab   : > { %3069 = vmatprep.subr.bf16.mxu1 %v3399_v0 }
0x11b1   : > { %3060 = vmatmul.mubr.msk.bf16.vlgmr.msra.gmra.mrb[44].mxu1 %vm899_vm7, %v2159_v63 }
0x11b2   : > { %3073 = vmatprep.mubr.msk.bf16.mxu1 %vm3400_vm1, %v3399_v0 }
0x126c   : > { %v1839_v26 = vpop.f32.mrb[32].mxu1 }
0x126d   : > { %v3025_v27 = vpop.f32.mrb[33].mxu1  ;;  %v1846_v28 = vsel %vm947_vm8, %v1839_v26, -inf }
0x126e   : > { %1847 = vmax.xlane.f32.xlu1 %v1846_v28  ;;  %v1842_v29 = vpop.f32.mrb[34].mxu1 }
0x126f   : > { %v3026_v30 = vpop.f32.mrb[35].mxu1  ;;  %v1849_v31 = vsel %vm947_vm8, %v1842_v29, -inf }
0x1270   : > { %1850 = vmax.xlane.f32.xlu0 %v1849_v31 }
0x1274   : > { %v1960_v32 = vpop.f32.mrb[36].mxu1 }
0x1275   : > { %v3037_v33 = vpop.f32.mrb[37].mxu1  ;;  %v1967_v34 = vsel %vm947_vm8, %v1960_v32, -inf }
0x1276   : > { %1968 = vmax.xlane.f32.xlu0 %v1967_v34  ;;  %v1963_v35 = vpop.f32.mrb[38].mxu1 }
0x1277   : > { %v3038_v36 = vpop.f32.mrb[39].mxu1  ;;  %v1970_v37 = vsel %vm947_vm8, %v1963_v35, -inf }
0x1278   : > { %1971 = vmax.xlane.f32.xlu1 %v1970_v37 }
0x127c   : > { %v2081_v38 = vpop.f32.mrb[40].mxu1 }
0x127d   : > { %v3049_v39 = vpop.f32.mrb[41].mxu1  ;;  %v2088_v40 = vsel %vm947_vm8, %v2081_v38, -inf }
0x127e   : > { %2089 = vmax.xlane.f32.xlu0 %v2088_v40  ;;  %v2084_v41 = vpop.f32.mrb[42].mxu1 }
0x127f   : > { %v3050_v42 = vpop.f32.mrb[43].mxu1  ;;  %v2091_v53 = vsel %vm947_vm8, %v2084_v41, -inf }
0x1280   : > { %2092 = vmax.xlane.f32.xlu1 %v2091_v53 }
0x1284   : > { %v2202_v54 = vpop.f32.mrb[44].mxu1 }
0x1285   : > { %v3061_v43 = vpop.f32.mrb[45].mxu1  ;;  %v2209_v44 = vsel %vm947_vm8, %v2202_v54, -inf }
0x1286   : > { %2210 = vmax.xlane.f32.xlu0 %v2209_v44  ;;  %v2205_v45 = vpop.f32.mrb[46].mxu1 }
0x1287   : > { %v3062_v46 = vpop.f32.mrb[47].mxu1  ;;  %v2212_v47 = vsel %vm947_vm8, %v2205_v45, -inf }
0x1288   : > { %2213 = vmax.xlane.f32.xlu1 %v2212_v47 }
0x12fb   : > { %v1848_v48 = vpop.xlane.xlu1 %1847 }
0x12fc   : > { %v1852_v49 = vsub.f32 %v1839_v26, %v1848_v48 }
0x12fd   : > { %v1851_v50 = vpop.xlane.xlu0 %1850 }
0x12fe   : > { %v1854_v51 = vmul.f32 1.442695, %v1852_v49  ;;  %v1853_v52 = vsub.f32 %v1842_v29, %v1851_v50 }
0x1300   : > { %3291 = vpow2.f32 %v1854_v51  ;;  %v1856_v55 = vmul.f32 1.442695, %v1853_v52 }
0x1302   : > { %3293 = vpow2.f32 %v1856_v55 }
0x1303   : > { %v1969_v56 = vpop.xlane.xlu0 %1968 }
0x1304   : > { %v1973_v57 = vsub.f32 %v1960_v32, %v1969_v56 }
0x1305   : > { %v1972_v3 = vpop.xlane.xlu1 %1971 }
0x1306   : > { %v1975_v58 = vmul.f32 1.442695, %v1973_v57  ;;  %v1974_v4 = vsub.f32 %v1963_v35, %v1972_v3 }
0x1308   : > { %3295 = vpow2.f32 %v1975_v58  ;;  %v1977_v9 = vmul.f32 1.442695, %v1974_v4 }
0x130a   : > { %v3292_v59 = vpop.eup %3291  ;;  %3297 = vpow2.f32 %v1977_v9 }
0x130b   : > { %v1858_v60 = vsel %vm947_vm8, %v3292_v59, 0.0  ;;  %v2090_v8 = vpop.xlane.xlu0 %2089 }
0x130c   : > { %v3294_v61 = vpop.eup %3293  ;;  %1859 = vadd.xlane.f32.xlu0 %v1858_v60  ;;  %v2094_v12 = vsub.f32 %v2081_v38, %v2090_v8  ;;  %v3215_v8 = vld [vmem:[%s4044_s6 + $0x10] sm:$0xff]  }
0x130d   : > { %v1861_v62 = vsel %vm947_vm8, %v3294_v61, 0.0  ;;  %v2093_v7 = vpop.xlane.xlu1 %2092  ;;  %3070 = vmatpush3.bf16.msra.mxu1 %v3215_v8 }
0x130e   : > { %1862 = vadd.xlane.f32.xlu1 %v1861_v62  ;;  %v2095_v10 = vsub.f32 %v2084_v41, %v2093_v7  ;;  %v2096_v17 = vmul.f32 1.442695, %v2094_v12  ;;  %3071 = vmatprep.subr.bf16.mxu1 %v3399_v0 }
0x1310   : > { %v2098_v14 = vmul.f32 1.442695, %v2095_v10 }
0x1312   : > { %v3875_v1 = vpop.eup %3295  ;;  %3299 = vpow2.f32 %v2098_v14 }
0x1313   : > { %v1979_v2 = vsel %vm947_vm8, %v3875_v1, 0.0  ;;  %v2211_v13 = vpop.xlane.xlu0 %2210  ;;  %3301 = vpow2.f32 %v2096_v17 }
0x1314   : > { %1980 = vadd.xlane.f32.xlu0 %v1979_v2  ;;  %v2215_v18 = vsub.f32 %v2202_v54, %v2211_v13  ;;  %v3298_v21 = vpop.eup %3297  ;;  %v3216_v13 = vld [vmem:[%s4044_s6 + $0x18] sm:$0xff]  }
0x1315   : > { %v2214_v11 = vpop.xlane.xlu1 %2213  ;;  %v1982_v22 = vsel %vm947_vm8, %v3298_v21, 0.0  ;;  %3072 = vmatpush3.bf16.msra.mxu1 %v3216_v13 }
0x1316   : > { %v2216_v16 = vsub.f32 %v2205_v45, %v2214_v11  ;;  %v2217_v20 = vmul.f32 1.442695, %v2215_v18  ;;  %3085 = vmatprep.subr.bf16.mxu1 %v3399_v0 }
0x1318   : > { %v2219_v19 = vmul.f32 1.442695, %v2216_v16 }
0x131a   : > { %3303 = vpow2.f32 %v2219_v19 }
0x131b   : > { %3305 = vpow2.f32 %v2217_v20 }
0x131c   : > { %v3300_v23 = vpop.eup %3299 }
0x131d   : > { %v3302_v24 = vpop.eup %3301  ;;  %v2103_v25 = vsel %vm947_vm8, %v3300_v23, 0.0 }
0x131e   : > { %v2100_v26 = vsel %vm947_vm8, %v3302_v24, 0.0 }
0x131f   : > { %1990 = vrot.lane.b32.xlu1 %v3828_v15, %s4061_s16 }
0x1324   : > { %v3885_v63 = vpop.eup %3303 }
0x1325   : > { %v3306_v27 = vpop.eup %3305  ;;  %v2224_v28 = vsel %vm947_vm8, %v3885_v63, 0.0 }
0x1326   : > { %v2221_v29 = vsel %vm947_vm8, %v3306_v27, 0.0 }
0x132a   : > { %1869 = vrot.lane.b32.xlu0 %v3828_v15, %s4062_s17  ;;  %s323_s17 = sand.u32 1, %s3389_s10  }
0x132b   : > { %s2641_s14 = scalar_lea.sflag [#allocation4], %s323_s17 }
0x1343   : > { %1983 = vadd.xlane.f32.xlu1 %v1982_v22 }
0x1347   : > { %2104 = vadd.xlane.f32.xlu1 %v2103_v25 }
0x1349   : > { %2101 = vadd.xlane.f32.xlu0 %v2100_v26 }
0x134b   : > { %2225 = vadd.xlane.f32.xlu1 %v2224_v28 }
0x134d   : > { %2222 = vadd.xlane.f32.xlu0 %v2221_v29 }
0x135c   : > { %2111 = vrot.lane.b32.xlu1 %v3828_v15, %s4063_s22  ;;  %s2814_s22 = sshll.u32 %s3488_s13, 4  ;;  %s3416_s13 = smov [#allocation3]  }
0x135d   : > { %s3995_s29 = scalar_lea.hbm %s4047_s9, %s2814_s22 }
0x1363   : > { %2232 = vrot.lane.b32.xlu0 %v3828_v15, %s4064_s23  ;;  %s324_s23 = scalar_lea.vmem [#allocation3], %s323_s17 }
0x1364   : > { %s2653_s25 = sshll.u32 %s324_s23, 4  ;;  %s3997_s25 = int_to_ptr.vmem [resolvable:$true] %s2653_s25 }
0x1399   : > { %v1860_v30 = vpop.xlane.xlu0 %1859 }
0x139a   : > { %3307 = vrcp.f32 %v1860_v30 }
0x139b   : > { %v1863_v31 = vpop.xlane.xlu1 %1862 }
0x139c   : > { %3309 = vrcp.f32 %v1863_v31 }
0x139f   : > { %v1991_v39 = vpop.permute.xlu1 %1990 }
0x13a1   : > { %v1981_v32 = vpop.xlane.xlu0 %1980 }
0x13a2   : > { %3311 = vrcp.f32 %v1981_v32 }
0x13a4   : > { %v3308_v33 = vpop.eup %3307 }
0x13a5   : > { %v1870_v34 = vpop.permute.xlu0 %1869  ;;  %v1866_v36 = vmul.f32 %v3308_v33, %v3292_v59 }
0x13a6   : > { %v3310_v35 = vpop.eup %3309  ;;  %3028 = vmatpush3.bf16.msra.mxu0 %v1870_v34 }
0x13a7   : > { %v1867_v37 = vmul.f32 %v3310_v35, %v3294_v61  ;;  %3039 = vmatprep.subr.bf16.mxu0 %v3399_v0 }
0x13a9   : > { %v1868_v38 = vpack.c.bf16 %v1867_v37, %v1866_v36 }
0x13ab   : > { %3030 = vmatmul.mubr.msk.bf16.vlgmr.msra.gmra.mrb[40].mxu0 %vm947_vm8, %v1868_v38  ;;  %v2784_v38 = vld [vmem:[%s4039_s1 + $0x10] ss:$0 sm:$0xff] }
0x13ac   : > { %3040 = vmatpush3.bf16.msra.mxu0 %v1991_v39  ;;  %3041 = vmatprep.mubr.msk.bf16.mxu0 %vm3400_vm1, %v3399_v0  ;;  %v3312_v42 = vpop.eup %3311 }
0x13ad   : > { %3051 = vmatprep.subr.bf16.mxu0 %v3399_v0  ;;  %v1987_v44 = vmul.f32 %v3312_v42, %v3875_v1 }
0x13d0   : > { %v1984_v15 = vpop.xlane.xlu1 %1983 }
0x13d1   : > { %3313 = vrcp.f32 %v1984_v15 }
0x13d4   : > { %v2105_v40 = vpop.xlane.xlu1 %2104 }
0x13d5   : > { %3315 = vrcp.f32 %v2105_v40 }
0x13d6   : > { %v2102_v41 = vpop.xlane.xlu0 %2101 }
0x13d7   : > { %3317 = vrcp.f32 %v2102_v41 }
0x13d8   : > { %v2226_v53 = vpop.xlane.xlu1 %2225 }
0x13da   : > { %v2223_v54 = vpop.xlane.xlu0 %2222 }
0x13db   : > { %v3314_v43 = vpop.eup %3313  ;;  %3319 = vrcp.f32 %v2223_v54 }
0x13dc   : > { %v1988_v45 = vmul.f32 %v3314_v43, %v3298_v21  ;;  %3321 = vrcp.f32 %v2226_v53  ;;  %v2112_v48 = vpop.permute.xlu1 %2111 }
0x13de   : > { %v1989_v46 = vpack.c.bf16 %v1988_v45, %v1987_v44  ;;  %v2233_v56 = vpop.permute.xlu0 %2232 }
0x13df   : > { %v3316_v47 = vpop.eup %3315 }
0x13e0   : > { %3042 = vmatmul.mubr.msk.bf16.vlgmr.msra.gmra.mrb[44].mxu0 %vm947_vm8, %v1989_v46  ;;  %v2109_v51 = vmul.f32 %v3316_v47, %v3300_v23 }
0x13e1   : > { %v3318_v49 = vpop.eup %3317  ;;  %3052 = vmatpush3.bf16.msra.mxu0 %v2112_v48  ;;  %3053 = vmatprep.mubr.msk.bf16.mxu0 %vm3400_vm1, %v3399_v0 }
0x13e2   : > { %v2108_v50 = vmul.f32 %v3318_v49, %v3302_v24  ;;  %3063 = vmatprep.subr.bf16.mxu0 %v3399_v0 }
0x13e4   : > { %v2110_v52 = vpack.c.bf16 %v2109_v51, %v2108_v50 }
0x13e5   : > { %v3320_v55 = vpop.eup %3319 }
0x13e6   : > { %v3322_v57 = vpop.eup %3321  ;;  %v2229_v58 = vmul.f32 %v3320_v55, %v3306_v27 }
0x13e7   : > { %v2230_v59 = vmul.f32 %v3322_v57, %v3885_v63  ;;  %v3218_v57 = vld [vmem:[%s4045_s7 + $0x18] sm:$0xff]  }
0x13e8   : > { %3054 = vmatmul.mubr.msk.bf16.vlgmr.msra.gmra.mrb[48].mxu0 %vm947_vm8, %v2110_v52 }
0x13e9   : > { %3064 = vmatpush3.bf16.msra.mxu0 %v2233_v56  ;;  %3065 = vmatprep.mubr.msk.bf16.mxu0 %vm3400_vm1, %v3399_v0  ;;  %v2231_v60 = vpack.c.bf16 %v2230_v59, %v2229_v58 }
0x13ea   : > { %3077 = vmatprep.subr.bf16.mxu0 %v3399_v0 }
0x13f0   : > { %3066 = vmatmul.mubr.msk.bf16.vlgmr.msra.gmra.mrb[52].mxu0 %vm947_vm8, %v2231_v60 }
0x13f1   : > { %3081 = vmatprep.mubr.msk.bf16.mxu0 %vm3400_vm1, %v3399_v0 }
0x147e   : > { %v1909_v61 = vpop.f32.mrb[40].mxu0 }
0x147f   : > { %v3031_v62 = vpop.f32.mrb[41].mxu0 }
0x1480   : > { %v1912_v1 = vpop.f32.mrb[42].mxu0 }
0x1481   : > { %v3032_v2 = vpop.f32.mrb[43].mxu0 }
0x14b3   : > { %v2030_v3 = vpop.f32.mrb[44].mxu0 }
0x14b4   : > { %v3043_v4 = vpop.f32.mrb[45].mxu0 }
0x14b5   : > { %v2033_v7 = vpop.f32.mrb[46].mxu0  ;;  %v2788_v4 = vld [vmem:[%s4039_s1 + $0x11] ss:$0 sm:$0xff] }
0x14b6   : > { %v3179_v9 = vpack.i.bf16 %v2033_v7, %v2030_v3  ;;  %v3044_v10 = vpop.f32.mrb[47].mxu0 }
0x14b7   : > { %v2789_v10 = vld [vmem:[%s4039_s1 + $0x12] ss:$0 sm:$0xff] }
0x14b8   : > { %3180 = vrot.lane.b32.xlu1 %v3179_v9, %s4065_s27 }
0x14bb   : > { %v2151_v11 = vpop.f32.mrb[48].mxu0 }
0x14bc   : > { %v3055_v12 = vpop.f32.mrb[49].mxu0 }
0x14bd   : > { %v2154_v14 = vpop.f32.mrb[50].mxu0 }
0x14be   : > { %v3184_v16 = vpack.i.bf16 %v2154_v14, %v2151_v11  ;;  %v3056_v17 = vpop.f32.mrb[51].mxu0 }
0x14bf   : > { %v3220_v17 = vld [vmem:[%s4046_s8 + $0x28] sm:$0xff]  }
0x14c0   : > { %3185 = vrot.lane.b32.xlu0 %v3184_v16, %s4066_s26  ;;  %v3219_v16 = vld [vmem:[%s4046_s8 + $0x20] sm:$0xff]   ;;  %s3335_s26 = scalar_lea.vmem %s3997_s25, 16 }
0x14c1   : > { %p3336_p11 = scmp.ne.s32.totalorder %s3997_s25, %s3335_s26 }
0x14c3   : > { %v2272_v18 = vpop.f32.mrb[52].mxu0  ;;  %p3337_p12 = pnand %p3336_p11, %p3505_p5 }
0x14c4   : > { %v3067_v19 = vpop.f32.mrb[53].mxu0 }
0x14c5   : > { %v2275_v20 = vpop.f32.mrb[54].mxu0  ;;  %v3222_v19 = vld [vmem:[%s4046_s8 + $0x38] sm:$0xff]   ;;  %p3338_p13 = pneg %p3337_p12 }
0x14c6   : > { %v3189_v21 = vpack.i.bf16 %v2275_v20, %v2272_v18  ;;  %v3068_v22 = vpop.f32.mrb[55].mxu0  ;;  %v3221_v18 = vld [vmem:[%s4046_s8 + $0x30] sm:$0xff]  }
0x14c7   : > { %v2794_v20 = vld [vmem:[%s4039_s1 + $0x13] ss:$0 sm:$0xff] }
0x14c8   : > { %3190 = vrot.lane.b32.xlu1 %v3189_v21, %s4067_s28  ;;  %s3339_s28 = sshll.u32 %s3416_s13, 4  ;;  %s3340_s28 = int_to_ptr.vmem [resolvable:$false] %s3339_s28 }
0x14c9   : > { %s3341_s21 = scalar_lea.vmem %s3340_s28, 32  ;;  %p3342_p0 = scmp.lt.s32.totalorder %s3997_s25, %s3340_s28 }
0x14ca   : > { %p3343_p1 = scmp.lt.s32.totalorder %s3341_s21, %s3335_s26 }
0x14cc   : > { %p3344_p2 = por %p3343_p1, %p3342_p0 }
0x14ce   : > { %p3345_p3 = pnand %p3344_p2, %p3338_p13 }
0x152a   : > { %v3181_v23 = vpop.permute.xlu1 %3180 }
0x152b   : > { %v3183_v25 = vunpack.i.h.bf16 %v3181_v23  ;;  %v3182_v63 = vunpack.i.l.bf16 %v3181_v23 }
0x152d   : > { %v2304_v29 = vsel %vm899_vm7, %v1912_v1, %v3183_v25  ;;  %v2303_v30 = vsel %vm899_vm7, %v1909_v61, %v3182_v63 }
0x1532   : > { %v3186_v24 = vpop.permute.xlu0 %3185 }
0x1533   : > { %v3188_v26 = vunpack.i.h.bf16 %v3186_v24  ;;  %v3187_v27 = vunpack.i.l.bf16 %v3186_v24 }
0x1535   : > { %v2306_v33 = vsel %vm947_vm8, %v2304_v29, %v3188_v26  ;;  %v2305_v34 = vsel %vm947_vm8, %v2303_v30, %v3187_v27 }
0x153a   : > { %v3191_v28 = vpop.permute.xlu1 %3190 }
0x153b   : > { %v3193_v31 = vunpack.i.h.bf16 %v3191_v28  ;;  %v3192_v32 = vunpack.i.l.bf16 %v3191_v28 }
0x153d   : > { %v2308_v35 = vsel %vm1409_vm9, %v2306_v33, %v3193_v31  ;;  %v2307_v36 = vsel %vm1409_vm9, %v2305_v34, %v3192_v32 }
0x153e   : > { %v2309_v37 = vpack.c.bf16 %v2308_v35, %v2307_v36 }
0x1540   : > { %3074 = vmatmul.mubr.msk.bf16.vlgmr.msra.gmra.mrb[48].mxu1 %vm416_vm3, %v2309_v37 }
0x1541   : > { %3093 = vmatprep.mubr.msk.bf16.mxu1 %vm3400_vm1, %v3399_v0  ;;  %3086 = vmatpush3.bf16.msra.mxu1 %v3219_v16 }
0x1542   : > { %3087 = vmatprep.subr.bf16.mxu1 %v3399_v0 }
0x1545   : > { %3088 = vmatpush3.bf16.msra.mxu1 %v3220_v17 }
0x1546   : > { %3089 = vmatprep.subr.bf16.mxu1 %v3399_v0 }
0x1549   : > { %3090 = vmatpush3.bf16.msra.mxu1 %v3221_v18 }
0x154a   : > { %3091 = vmatprep.subr.bf16.mxu1 %v3399_v0 }
0x154d   : > { %3092 = vmatpush3.bf16.msra.mxu1 %v3222_v19 }
0x1613   : > { %v2369_v39 = vpop.f32.mrb[48].mxu1 }
0x1614   : > { %v2370_v15 = vadd.f32 %v2784_v38, %v2369_v39  ;;  %v3075_v40 = vpop.f32.mrb[49].mxu1 }
0x1615   : > { %v2372_v41 = vpop.f32.mrb[50].mxu1 }
0x1616   : > { %v2373_v42 = vadd.f32 %v2784_v38, %v2372_v41  ;;  %v3076_v53 = vpop.f32.mrb[51].mxu1  ;;  %v2376_v54 = vadd.f32 %v2370_v15, %v3816_v5 }
0x1617   : > { %v2806_v53 = vld [vmem:[%s4039_s1 + $0x14] ss:$0 sm:$0xff] }
0x1618   : > { %v2380_v43 = vsel %vm416_vm3, %v2376_v54, 0.0  ;;  %v2377_v44 = vadd.f32 %v2373_v42, %v3818_v6  ;;  %v3217_v6 = vld [vmem:[%s4045_s7 + $0x10] sm:$0xff]  }
0x1619   : > { %2381 = vadd.xlane.f32.xlu0 %v2380_v43  ;;  %3078 = vmatpush3.bf16.msra.mxu0 %v3217_v6 }
0x161a   : > { %v2383_v45 = vsel %vm416_vm3, %v2377_v44, 0.0  ;;  %3079 = vmatprep.subr.bf16.mxu0 %v3399_v0 }
0x161b   : > { %2384 = vadd.xlane.f32.xlu1 %v2383_v45 }
0x161d   : > { %3080 = vmatpush3.bf16.msra.mxu0 %v3218_v57 }
0x16a6   : > { %v2382_v46 = vpop.xlane.xlu0 %2381 }
0x16a7   : > { %v2386_v47 = vmul.f32 0.03125, %v2382_v46 }
0x16a8   : > { %v2385_v48 = vpop.xlane.xlu1 %2384 }
0x16a9   : > { %v2388_v49 = vsub.f32 %v2376_v54, %v2386_v47  ;;  %v2387_v50 = vmul.f32 0.03125, %v2385_v48 }
0x16ab   : > { %v2389_v51 = vsub.f32 %v2377_v44, %v2387_v50  ;;  %v2390_v52 = vmul.f32 %v2388_v49, %v2388_v49 }
0x16ad   : > { %v2392_v55 = vsel %vm416_vm3, %v2390_v52, 0.0  ;;  %v2391_v56 = vmul.f32 %v2389_v51, %v2389_v51 }
0x16ae   : > { %2393 = vadd.xlane.f32.xlu0 %v2392_v55 }
0x16af   : > { %v2395_v5 = vsel %vm416_vm3, %v2391_v56, 0.0 }
0x16b2   : > { %2396 = vadd.xlane.f32.xlu0 %v2395_v5 }
0x173b   : > { %v2394_v58 = vpop.xlane.xlu0 %2393 }
0x173c   : > { %v2398_v59 = vmul.f32 0.03125, %v2394_v58 }
0x173e   : > { %v2400_v60 = vadd.f32 1e-05, %v2398_v59 }
0x173f   : > { %v2397_v61 = vpop.xlane.xlu0 %2396 }
0x1740   : > { %3323 = vrsqrt.f32 %v2400_v60  ;;  %v2399_v62 = vmul.f32 0.03125, %v2397_v61 }
0x1742   : > { %v2401_v1 = vadd.f32 1e-05, %v2399_v62 }
0x1744   : > { %3325 = vrsqrt.f32 %v2401_v1 }
0x174a   : > { %v3324_v2 = vpop.eup %3323 }
0x174b   : > { %v2404_v3 = vmul.f32 %v3324_v2, %v2388_v49 }
0x174d   : > { %v2410_v8 = vmul.f32 %v2788_v4, %v2404_v3 }
0x174e   : > { %v3326_v7 = vpop.eup %3325 }
0x174f   : > { %v2405_v9 = vmul.f32 %v3326_v7, %v2389_v51  ;;  %v2416_v12 = vadd.f32 %v2789_v10, %v2410_v8 }
0x1751   : > { %v2411_v11 = vmul.f32 %v2788_v4, %v2405_v9  ;;  %v2812_v9 = vld [vmem:[%s4039_s1 + $0x15] ss:$0 sm:$0xff] }
0x1753   : > { %v2417_v13 = vadd.f32 %v2789_v10, %v2411_v11 }
0x1755   : > { %v2418_v14 = vpack.c.bf16 %v2417_v13, %v2416_v12 }
0x1757   : > { %3082 = vmatmul.mubr.msk.bf16.vlgmr.msra.gmra.mrb[56].mxu0 %vm416_vm3, %v2418_v14 }
0x182a   : > { %v2478_v21 = vpop.f32.mrb[56].mxu0 }
0x182b   : > { %v2479_v22 = vadd.f32 %v2794_v20, %v2478_v21  ;;  %v3083_v23 = vpop.f32.mrb[57].mxu0 }
0x182c   : > { %v2481_v24 = vpop.f32.mrb[58].mxu0 }
0x182d   : > { %v2485_v25 = vmul.f32 %v2479_v22, %v2479_v22  ;;  %v2482_v63 = vadd.f32 %v2794_v20, %v2481_v24  ;;  %v3084_v26 = vpop.f32.mrb[59].mxu0 }
0x182f   : > { %v2487_v27 = vmul.f32 %v2485_v25, %v2479_v22  ;;  %v2486_v28 = vmul.f32 %v2482_v63, %v2482_v63 }
0x1831   : > { %v2489_v29 = vmul.f32 0.044715, %v2487_v27  ;;  %v2488_v0 = vmul.f32 %v2486_v28, %v2482_v63 }
0x1833   : > { %v2491_v30 = vadd.f32 %v2489_v29, %v2479_v22  ;;  %v2490_v31 = vmul.f32 0.044715, %v2488_v0 }
0x1835   : > { %v2493_v32 = vmul.f32 0.7978846, %v2491_v30  ;;  %v2492_v33 = vadd.f32 %v2490_v31, %v2482_v63 }
0x1837   : > { %3327 = vtanh.f32 %v2493_v32  ;;  %v2494_v34 = vmul.f32 0.7978846, %v2492_v33 }
0x1839   : > { %3329 = vtanh.f32 %v2494_v34 }
0x1841   : > { %v3328_v35 = vpop.eup %3327 }
0x1842   : > { %v2497_v36 = vadd.f32 1.0, %v3328_v35 }
0x1843   : > { %v3330_v37 = vpop.eup %3329 }
0x1844   : > { %v2499_v38 = vmul.f32 0.5, %v2497_v36  ;;  %v2498_v39 = vadd.f32 1.0, %v3330_v37 }
0x1846   : > { %v2500_v15 = vmul.f32 0.5, %v2498_v39  ;;  %v2501_v40 = vmul.f32 %v2499_v38, %v2479_v22 }
0x1848   : > { %v2502_v41 = vmul.f32 %v2500_v15, %v2482_v63 }
0x184a   : > { %v2503_v42 = vpack.c.bf16 %v2502_v41, %v2501_v40 }
0x184c   : > { %3094 = vmatmul.mubr.msk.bf16.vlgmr.msra.gmra.mrb[52].mxu1 %vm567_vm5, %v2503_v42 }
0x191f   : > { %v2579_v54 = vpop.f32.mrb[52].mxu1 }
0x1920   : > { %v2580_v43 = vadd.f32 %v2806_v53, %v2579_v54  ;;  %v3095_v44 = vpop.f32.mrb[53].mxu1 }
0x1921   : > { %v2582_v45 = vpop.f32.mrb[54].mxu1 }
0x1922   : > { %v2583_v46 = vadd.f32 %v2806_v53, %v2582_v45  ;;  %v3096_v47 = vpop.f32.mrb[55].mxu1  ;;  %v2586_v48 = vadd.f32 %v2580_v43, %v2416_v12  ;;  %v2813_v12 = vld [vmem:[%s4039_s1 + $0x16] ss:$0 sm:$0xff] }
0x1924   : > { %v2590_v49 = vsel %vm416_vm3, %v2586_v48, 0.0  ;;  %v2587_v50 = vadd.f32 %v2583_v46, %v2417_v13 }
0x1925   : > { %2591 = vadd.xlane.f32.xlu1 %v2590_v49 }
0x1926   : > { %v2593_v51 = vsel %vm416_vm3, %v2587_v50, 0.0 }
0x1927   : > { %2594 = vadd.xlane.f32.xlu0 %v2593_v51 }
0x19b2   : > { %v2592_v52 = vpop.xlane.xlu1 %2591 }
0x19b3   : > { %v2596_v55 = vmul.f32 0.03125, %v2592_v52 }
0x19b4   : > { %v2595_v56 = vpop.xlane.xlu0 %2594 }
0x19b5   : > { %v2598_v5 = vsub.f32 %v2586_v48, %v2596_v55  ;;  %v2597_v6 = vmul.f32 0.03125, %v2595_v56 }
0x19b7   : > { %v2599_v57 = vsub.f32 %v2587_v50, %v2597_v6  ;;  %v2600_v58 = vmul.f32 %v2598_v5, %v2598_v5 }
0x19b9   : > { %v2602_v59 = vsel %vm416_vm3, %v2600_v58, 0.0  ;;  %v2601_v60 = vmul.f32 %v2599_v57, %v2599_v57 }
0x19ba   : > { %2603 = vadd.xlane.f32.xlu1 %v2602_v59 }
0x19bb   : > { %v2605_v61 = vsel %vm416_vm3, %v2601_v60, 0.0 }
0x19bc   : > { %2606 = vadd.xlane.f32.xlu0 %v2605_v61 }
0x1a47   : > { %v2604_v62 = vpop.xlane.xlu1 %2603 }
0x1a48   : > { %v2608_v1 = vmul.f32 0.03125, %v2604_v62 }
0x1a49   : > { %v2607_v2 = vpop.xlane.xlu0 %2606 }
0x1a4a   : > { %v2610_v3 = vadd.f32 1e-05, %v2608_v1  ;;  %v2609_v4 = vmul.f32 0.03125, %v2607_v2 }
0x1a4c   : > { %3331 = vrsqrt.f32 %v2610_v3  ;;  %v2611_v7 = vadd.f32 1e-05, %v2609_v4 }
0x1a4e   : > { %3333 = vrsqrt.f32 %v2611_v7 }
0x1a56   : > { %v3332_v8 = vpop.eup %3331 }
0x1a57   : > { %v2614_v10 = vmul.f32 %v3332_v8, %v2598_v5 }
0x1a58   : > { %v3334_v11 = vpop.eup %3333 }
0x1a59   : > { %v2620_v13 = vmul.f32 %v2812_v9, %v2614_v10  ;;  %v2615_v14 = vmul.f32 %v3334_v11, %v2599_v57 }
0x1a5b   : > { %v2626_v16 = vadd.f32 %v2813_v12, %v2620_v13  ;;  %v2621_v17 = vmul.f32 %v2812_v9, %v2615_v14 }
0x1a5d   : > { %v2627_v18 = vadd.f32 %v2813_v12, %v2621_v17  ;;  %v2628_v19 = vsel %vm416_vm3, %v2626_v16, 0.0 }
0x1a5f   : > { %v2629_v20 = vsel %vm416_vm3, %v2627_v18, 0.0 }
0x1a60   : > { %v2630_v21 = vadd.f32 %v2629_v20, %v2628_v19 }
0x1a62   : > { %v2631_v22 = vrot.slane %v2630_v21, 4 }
0x1a64   : > { %v2632_v23 = vadd.f32 %v2631_v22, %v2630_v21 }
0x1a66   : > { %v2633_v24 = vrot.slane %v2632_v23, 2 }
0x1a68   : > { %v2634_v25 = vadd.f32 %v2633_v24, %v2632_v23 }
0x1a6a   : > { %v2635_v63 = vrot.slane %v2634_v25, 1 }
0x1a6c   : > { %v2636_v26 = vadd.f32 %v2635_v63, %v2634_v25 }
0x1a6e   : > { %v2638_v27 = vmul.f32 0.0625, %v2636_v26 }
0x1a70   : > { %2639 = vst.msk [vmem:[%s324_s23] sm:$0x1] %vm424_vm4, %v2638_v27 }
0x1a71   : > { %3348 = shalt.err (!%p3345_p3)
}
0x1a72   : > { %s3349_s16 = scalar_lea.hbm %s3995_s29, 16  ;;  %s3353_s23 = scalar_lea.hbm %s4047_s9, 32 }
0x1a73   : > { %p3350_p4 = scmp.ne.s32.totalorder %s3995_s29, %s3349_s16  ;;  %p3354_p9 = scmp.lt.u32.totalorder %s3995_s29, %s4047_s9 }
0x1a74   : > { %p3355_p10 = scmp.lt.u32.totalorder %s3353_s23, %s3349_s16  ;;  %p3357_p12 = scmp.lt.u32.totalorder %s3349_s16, %s3995_s29 }
0x1a75   : > { %p3351_p7 = pnand %p3350_p4, %p3505_p5 }
0x1a76   : > { %p3356_p11 = por %p3355_p10, %p3354_p9 }
0x1a77   : > { %p3352_p8 = pneg %p3351_p7 }
0x1a78   : > { %p3358_p13 = por %p3357_p12, %p3356_p11 }
0x1a7a   : > { %p3359_p0 = pnand %p3358_p13, %p3352_p8 }
0x1a7c   : > { %3362 = shalt.err (!%p3359_p0)
}
0x1a7d   : > { %3098 = dma.vmem_to_hbm [thread:$0]  (%p3505_p5), %s3997_s25, 16, %s3995_s29, %s2641_s14  }
0x1a7e PF: > { %p3104_p1 = scmp.ge.s32.totalorder %s3397_s12, 2  ;;  %s2665_s26 = sand.u32 1, %s3385_s30  }
0x1a7f   : > { %s2666_s13 = scalar_lea.sflag [#allocation4], %s2665_s26 }
0x1a80   : > { %p3101_p2 = pnand %p3104_p1, %p3509_p6 }
0x1a82   : > { %3380 = dma.done.wait (!%p3101_p2), %s2666_s13, 16  }
0x1a83   : > { %3382 = vsyncadd (!%p3101_p2), %s2666_s13, 4294967280  ;;  %p19_p3 = scmp.ge.s32.totalorder %s3492_s15, 4   ;;  %s4068_s30 = smov %s3389_s10 }
0x1a84   : > { %s4069_s10 = smov %s3393_s11  ;;  %s4070_s11 = smov %s3503_s18 }
0x1a85   : > { %s4071_s12 = smov %s3492_s15  ;;  %21 = sbr.rel (!%p19_p3) target bundleno = 3 (0x3), region = 100 }
0x1a8c   :  { %2670 = vsyncpa [#allocation4], 1 }
0x1a8d   :  { %2672 = vsyncpa [#allocation4 + $0x1], 1 }

</bundles_post_ra>
